<compile_context>
chip_gen: v7x
topology: tpu7x:2x2x1
jax: 0.10.0
libtpu: 0.0.40
codegen_flags: <defaults>
</compile_context>

<pallas_src>
import jax
import jax.numpy as jnp
from jax import lax
from jax.experimental import pallas as pl
from jax.experimental.pallas import tpu as pltpu

LANE = 128
SUBLANE = 8


def _round_up(x, m):
    return (x + m - 1) // m * m


def _pad_cout(c):
    """Modest output-channel padding (don't 16x a cout=8 layer; keep 128 for wide)."""
    if c % LANE == 0:
        return c
    if c >= LANE:
        return _round_up(c, LANE)
    return _round_up(c, SUBLANE)


def _vmem_capacity_bytes():
    try:
        return int(pltpu.get_tpu_info().vmem_capacity_bytes)
    except Exception:
        return 64 * 1024 * 1024      # conservative (v7x-sized) fallback


def _pick_row_tile(hp, cost_fn, budget):
    """Largest divisor th of hp whose per-step VMEM estimate fits the budget."""
    best = 1
    for d in range(1, hp + 1):
        if hp % d == 0 and cost_fn(d) <= budget:
            best = d
    return best


# ---------------------------------------------------------------------------
# In-kernel helpers
# ---------------------------------------------------------------------------
def _pool2x2(v):
    """2x2 max pool of a (2r, 2wp, C) VMEM value -> (r, wp, C)."""
    r2, w2, c = v.shape
    v = v.reshape(r2 // 2, 2, w2, c)
    v = jnp.maximum(v[:, 0], v[:, 1])            # row-pair max (leading dim: cheap)
    v = v.reshape(r2 // 2, w2 // 2, 2, c)
    return jnp.maximum(v[:, :, 0], v[:, :, 1])   # column-pair max


def _conv3x3_bn_relu(padded, w_ref, b_ref, out_dtype):
    """3x3 conv of an H-replicate-padded (th+2, wp, C) tile.

    W replicate padding is realized by the hoisted column-shifted slabs; the dy
    shifts are 8-aligned leading-dim slices of the flattened slabs.
    Returns (th, wp, coutp)."""
    thp2, wp, c = padded.shape
    th = thp2 - 2

    # Hoisted dx shifts -- built once per tile, native compute dtype, no casts.
    left = jnp.concatenate([padded[:, :1], padded[:, :-1]], axis=1)   # x-1 (replicate)
    right = jnp.concatenate([padded[:, 1:], padded[:, -1:]], axis=1)  # x+1 (replicate)
    slabs = (left.reshape(thp2 * wp, c),      # dx = 0
             padded.reshape(thp2 * wp, c),    # dx = 1
             right.reshape(thp2 * wp, c))     # dx = 2

    m = th * wp
    acc = None
    for dy in range(3):
        for dx in range(3):
            lhs = slabs[dx][dy * wp: dy * wp + m]          # 8-aligned static slice
            p = jnp.dot(lhs, w_ref[dy * 3 + dx],
                        preferred_element_type=jnp.float32)
            acc = p if acc is None else acc + p

    y = jnp.maximum(acc + b_ref[...], 0.0)                 # f32 epilogue (folded BN)
    return y.reshape(th, wp, -1).astype(out_dtype)


# ---------------------------------------------------------------------------
# Pallas kernels
# ---------------------------------------------------------------------------
def _pool_conv_kernel(body_ref, top_ref, bot_ref, w_ref, b_ref, o_ref):
    # body_ref: (2*th, W, Cin) raw rows of this tile (pre-pool)
    # top_ref / bot_ref: (2, W, Cin) raw row-pair producing the pooled halo row;
    #                    the index_map already clamps -> replicate at the edges.
    # w_ref: (9, Cin, Coutp) BN-folded weights; b_ref: (1, Coutp) BN shift (f32)
    # o_ref: (th, Wp, Coutp)
    padded = jnp.concatenate(
        [_pool2x2(top_ref[...]), _pool2x2(body_ref[...]), _pool2x2(bot_ref[...])],
        axis=0)                                            # (th+2, Wp, Cin)
    o_ref[...] = _conv3x3_bn_relu(padded, w_ref, b_ref, o_ref.dtype)


def _conv_kernel(body_ref, top_ref, bot_ref, w_ref, b_ref, o_ref):
    # body_ref: (th, Wp, C); top_ref / bot_ref: (1, Wp, C) clamped halo rows.
    padded = jnp.concatenate([top_ref[...], body_ref[...], bot_ref[...]], axis=0)
    o_ref[...] = _conv3x3_bn_relu(padded, w_ref, b_ref, o_ref.dtype)


# ---------------------------------------------------------------------------
# Wrappers
# ---------------------------------------------------------------------------
def pool_conv3x3_bn_relu(x_nhwc, w_taps, shift, *, row_tile=None,
                         compute_dtype=jnp.float32):
    """Fused MaxPool2d(2) + 3x3 conv (replicate pad) + folded-BN shift + ReLU."""
    n, h, w, cin = x_nhwc.shape
    assert h % 2 == 0 and w % 2 == 0, "MaxPool2d(2) requires even H and W"
    hp, wp = h // 2, w // 2
    assert w_taps.shape[0] == 9 and w_taps.shape[1] == cin, (w_taps.shape, cin)
    coutp = w_taps.shape[2]
    isz = jnp.dtype(compute_dtype).itemsize
    cap = _vmem_capacity_bytes()

    def cost(th):
        body = 2 * th * w * cin * isz
        halos = 2 * (2 * w * cin * isz)
        wts = 9 * cin * coutp * isz
        out = th * wp * coutp * isz
        tmp = 3 * (th + 2) * wp * cin * isz + th * wp * coutp * 4
        return 2 * (body + halos + wts + out) + tmp + (2 << 20)

    th = row_tile if row_tile is not None else _pick_row_tile(hp, cost, int(0.7 * cap))
    assert hp % th == 0, (hp, th)
    nt = hp // th

    x = x_nhwc.astype(compute_dtype)

    return pl.pallas_call(
        _pool_conv_kernel,
        out_shape=jax.ShapeDtypeStruct((n, hp, wp, coutp), compute_dtype),
        grid=(n, nt),
        in_specs=[
            # body rows of this tile (raw NHWC block -- no (…,2,…) sublane inflation)
            pl.BlockSpec((None, 2 * th, w, cin), lambda b, j: (b, j, 0, 0)),
            # raw row-pair of the pooled halo row above / below, clamped at the
            # edges -> exactly replicate padding of the pooled tensor.
            pl.BlockSpec((None, 2, w, cin),
                         lambda b, j: (b, jnp.maximum(j * th - 1, 0), 0, 0)),
            pl.BlockSpec((None, 2, w, cin),
                         lambda b, j: (b, jnp.minimum((j + 1) * th, hp - 1), 0, 0)),
            # resident weights / shift (constant index_map).
            # TODO(synk): on v7x, pipeline_mode=pl.Buffered(1) here would avoid
            #             double-buffering a constant block (pure VMEM waste).
            pl.BlockSpec((9, cin, coutp), lambda b, j: (0, 0, 0)),
            pl.BlockSpec((1, coutp), lambda b, j: (0, 0)),
        ],
        out_specs=pl.BlockSpec((None, th, wp, coutp), lambda b, j: (b, j, 0, 0)),
        compiler_params=pltpu.CompilerParams(
            dimension_semantics=("parallel", "parallel"),
            vmem_limit_bytes=int(0.85 * cap)),
    )(x, x, x, w_taps.astype(compute_dtype), shift.astype(jnp.float32))


def conv3x3_bn_relu(x_nhwc, w_taps, shift, *, row_tile=None,
                    compute_dtype=jnp.float32):
    """3x3 conv (replicate pad) + folded-BN shift + ReLU (no pooling)."""
    n, hp, wp, c = x_nhwc.shape
    assert w_taps.shape[0] == 9 and w_taps.shape[1] == c, (w_taps.shape, c)
    coutp = w_taps.shape[2]
    isz = jnp.dtype(compute_dtype).itemsize
    cap = _vmem_capacity_bytes()

    def cost(th):
        body = th * wp * c * isz
        halos = 2 * (wp * c * isz)
        wts = 9 * c * coutp * isz
        out = th * wp * coutp * isz
        tmp = 3 * (th + 2) * wp * c * isz + th * wp * coutp * 4
        return 2 * (body + halos + wts + out) + tmp + (2 << 20)

    th = row_tile if row_tile is not None else _pick_row_tile(hp, cost, int(0.7 * cap))
    assert hp % th == 0, (hp, th)
    nt = hp // th

    x = x_nhwc.astype(compute_dtype)

    return pl.pallas_call(
        _conv_kernel,
        out_shape=jax.ShapeDtypeStruct((n, hp, wp, coutp), compute_dtype),
        grid=(n, nt),
        in_specs=[
            pl.BlockSpec((None, th, wp, c), lambda b, j: (b, j, 0, 0)),
            pl.BlockSpec((None, 1, wp, c),
                         lambda b, j: (b, jnp.maximum(j * th - 1, 0), 0, 0)),
            pl.BlockSpec((None, 1, wp, c),
                         lambda b, j: (b, jnp.minimum((j + 1) * th, hp - 1), 0, 0)),
            pl.BlockSpec((9, c, coutp), lambda b, j: (0, 0, 0)),
            pl.BlockSpec((1, coutp), lambda b, j: (0, 0)),
        ],
        out_specs=pl.BlockSpec((None, th, wp, coutp), lambda b, j: (b, j, 0, 0)),
        compiler_params=pltpu.CompilerParams(
            dimension_semantics=("parallel", "parallel"),
            vmem_limit_bytes=int(0.85 * cap)),
    )(x, x, x, w_taps.astype(compute_dtype), shift.astype(jnp.float32))


# ---------------------------------------------------------------------------
# Down forward
# ---------------------------------------------------------------------------
def down_forward(x_nchw, params, *, compute_dtype=jnp.float32, row_tile=None):
    """Down: MaxPool2d(2) -> (Conv3x3 replicate-pad -> BN(eval) -> ReLU) x 2."""
    cout = params["out_channels"]
    x = jnp.transpose(x_nchw, (0, 2, 3, 1))               # NCHW -> NHWC (boundary only)
    y1 = pool_conv3x3_bn_relu(x, params["w1"], params["b1"],
                              row_tile=row_tile, compute_dtype=compute_dtype)
    y2 = conv3x3_bn_relu(y1, params["w2"], params["b2"],
                         row_tile=row_tile, compute_dtype=compute_dtype)
    y2 = y2[..., :cout]                                    # drop channel padding (no-op if none)
    return jnp.transpose(y2, (0, 3, 1, 2)).astype(x_nchw.dtype)


# ---------------------------------------------------------------------------
# Parameters (PyTorch-equivalent raw params + folded kernel params)
# ---------------------------------------------------------------------------
def init_raw_params(key, in_channels, out_channels):
    ks = jax.random.split(key, 10)
    # Conv weights in HWIO (transpose of PyTorch OIHW); bias=False.
    w1_hwio = 0.2 * jax.random.normal(ks[0], (3, 3, in_channels, out_channels), jnp.float32)
    w2_hwio = 0.2 * jax.random.normal(ks[1], (3, 3, out_channels, out_channels), jnp.float32)

    def bn(kg, kb, km, kv, c):
        return dict(
            gamma=1.0 + 0.1 * jax.random.normal(kg, (c,), jnp.float32),
            beta=0.1 * jax.random.normal(kb, (c,), jnp.float32),
            mean=0.1 * jax.random.normal(km, (c,), jnp.float32),
            var=jax.random.uniform(kv, (c,), jnp.float32, minval=0.5, maxval=1.5),
        )

    return dict(w1_hwio=w1_hwio, w2_hwio=w2_hwio,
                bn1=bn(ks[2], ks[3], ks[4], ks[5], out_channels),
                bn2=bn(ks[6], ks[7], ks[8], ks[9], out_channels),
                in_channels=in_channels, out_channels=out_channels)


def fold_params(raw, eps=1e-5):
    """Fold eval-mode BN into the conv weights; modest output-channel padding."""
    cin, cout = raw["in_channels"], raw["out_channels"]
    cout_p = _pad_cout(cout)

    def fold(w_hwio, bn, k_in, k_in_p):
        scale = bn["gamma"] / jnp.sqrt(bn["var"] + eps)          # (cout,)
        shift = bn["beta"] - bn["mean"] * scale                  # (cout,)
        w = w_hwio * scale[None, None, None, :]                  # fold BN scale
        w = jnp.pad(w, ((0, 0), (0, 0), (0, k_in_p - k_in), (0, cout_p - cout)))
        shift = jnp.pad(shift, (0, cout_p - cout))
        return w.reshape(9, k_in_p, cout_p), shift.reshape(1, cout_p)

    w1, b1 = fold(raw["w1_hwio"], raw["bn1"], cin, cin)          # conv1: K = cin
    w2, b2 = fold(raw["w2_hwio"], raw["bn2"], cout, cout_p)      # conv2: K = padded cout
    return dict(w1=w1, b1=b1, w2=w2, b2=b2,
                in_channels=cin, out_channels=cout)


# ---------------------------------------------------------------------------
# Pure-JAX reference (mirrors PyTorch eval-mode semantics)
# ---------------------------------------------------------------------------
def down_reference(x_nchw, raw, eps=1e-5):
    x = jnp.transpose(x_nchw, (0, 2, 3, 1))
    pooled = lax.reduce_window(x, -jnp.inf, lax.max, (1, 2, 2, 1), (1, 2, 2, 1), "VALID")

    def cbr(inp, w_hwio, bn):
        xp = jnp.pad(inp, ((0, 0), (1, 1), (1, 1), (0, 0)), mode="edge")
        y = lax.conv_general_dilated(xp, w_hwio, (1, 1), "VALID",
                                     dimension_numbers=("NHWC", "HWIO", "NHWC"))
        scale = bn["gamma"] / jnp.sqrt(bn["var"] + eps)
        return jnp.maximum((y - bn["mean"]) * scale + bn["beta"], 0.0)

    y1 = cbr(pooled, raw["w1_hwio"], raw["bn1"])
    y2 = cbr(y1, raw["w2_hwio"], raw["bn2"])
    return jnp.transpose(y2, (0, 3, 1, 2))


if __name__ == "__main__":
    key = jax.random.PRNGKey(0)
    k_x, k_p = jax.random.split(key)

    in_channels, out_channels = 4, 8
    x = jax.random.normal(k_x, (2, in_channels, 16, 16), jnp.float32)   # NCHW
    raw = init_raw_params(k_p, in_channels, out_channels)
    params = fold_params(raw)

    ref = jax.block_until_ready(down_reference(x, raw))

    # f32 path, auto row tile (single row tile -> edge-clamped halos exercised).
    out = jax.block_until_ready(down_forward(x, params, compute_dtype=jnp.float32))
    assert out.shape == (2, out_channels, 8, 8), out.shape
    assert jnp.allclose(out, ref, atol=1e-4, rtol=1e-4), \
        float(jnp.max(jnp.abs(out - ref)))

    # f32 path, forced multi-row-tile grid -> interior halo rows exercised too.
    out_t = jax.block_until_ready(down_forward(x, params, compute_dtype=jnp.float32,
                                               row_tile=2))
    assert jnp.allclose(out_t, ref, atol=1e-4, rtol=1e-4), \
        float(jnp.max(jnp.abs(out_t - ref)))

    # bf16 path: bf16 activations/weights (half the HBM bytes, bf16-native MXU),
    # f32 accumulation + f32 epilogue.  Note: BN scale is folded into the weights
    # before the bf16 cast (intentional deviation from conv-then-BN rounding).
    out_bf16 = jax.block_until_ready(down_forward(x, params, compute_dtype=jnp.bfloat16))
    assert out_bf16.shape == (2, out_channels, 8, 8), out_bf16.shape
    assert jnp.allclose(out_bf16.astype(jnp.float32), ref, atol=0.2, rtol=0.1), \
        float(jnp.max(jnp.abs(out_bf16.astype(jnp.float32) - ref)))

    print("KERNEL_OK")
</pallas_src>

<mosaic_0001>
module attributes {stable_mosaic.version = 11 : i64} {
  func.func @_pool_conv_kernel(%arg0: i32, %arg1: i32, %arg2: memref<1x16x16x4xf32, #tpu.memory_space<vmem>>, %arg3: memref<1x2x16x4xf32, #tpu.memory_space<vmem>>, %arg4: memref<1x2x16x4xf32, #tpu.memory_space<vmem>>, %arg5: memref<9x4x8xf32, #tpu.memory_space<vmem>>, %arg6: memref<1x8xf32, #tpu.memory_space<vmem>>, %arg7: memref<1x8x8x8xf32, #tpu.memory_space<vmem>>) attributes {dimension_semantics = [#tpu.dimension_semantics<parallel>, #tpu.dimension_semantics<parallel>], iteration_bounds = array<i64: 2, 1>, scalar_prefetch = 0 : i64, scratch_operands = 0 : i64, tpu.core_type = #tpu.core_type<tc>, window_params = [{transform_indices = @transform_0, window_bounds = array<i64: 1, 16, 16, 4>}, {transform_indices = @transform_1, window_bounds = array<i64: 1, 2, 16, 4>}, {transform_indices = @transform_2, window_bounds = array<i64: 1, 2, 16, 4>}, {pipeline_mode = #tpu.pipeline_mode<synchronous>, transform_indices = @transform_3, window_bounds = array<i64: 9, 4, 8>}, {pipeline_mode = #tpu.pipeline_mode<synchronous>, transform_indices = @transform_4, window_bounds = array<i64: 1, 8>}, {transform_indices = @transform_5, window_bounds = array<i64: 1, 8, 8, 8>}]} {
    %c0 = arith.constant 0 : index
    %c0_0 = arith.constant 0 : index
    %c0_1 = arith.constant 0 : index
    %c0_2 = arith.constant 0 : index
    %0 = vector.load %arg3[%c0, %c0_0, %c0_1, %c0_2] : memref<1x2x16x4xf32, #tpu.memory_space<vmem>>, vector<1x2x16x4xf32>
    %1 = vector.shape_cast %0 : vector<1x2x16x4xf32> to vector<2x16x4xf32>
    %2 = vector.shape_cast %1 : vector<2x16x4xf32> to vector<1x2x16x4xf32>
    %3 = vector.extract_strided_slice %2 {offsets = [0, 0, 0, 0], sizes = [1, 1, 16, 4], strides = [1, 1, 1, 1]} : vector<1x2x16x4xf32> to vector<1x1x16x4xf32>
    %4 = vector.shape_cast %3 : vector<1x1x16x4xf32> to vector<1x16x4xf32>
    %5 = vector.extract_strided_slice %2 {offsets = [0, 1, 0, 0], sizes = [1, 1, 16, 4], strides = [1, 1, 1, 1]} : vector<1x2x16x4xf32> to vector<1x1x16x4xf32>
    %6 = vector.shape_cast %5 : vector<1x1x16x4xf32> to vector<1x16x4xf32>
    %7 = arith.maximumf %4, %6 : vector<1x16x4xf32>
    %8 = vector.shape_cast %7 : vector<1x16x4xf32> to vector<1x8x2x4xf32>
    %9 = vector.extract_strided_slice %8 {offsets = [0, 0, 0, 0], sizes = [1, 8, 1, 4], strides = [1, 1, 1, 1]} : vector<1x8x2x4xf32> to vector<1x8x1x4xf32>
    %10 = vector.shape_cast %9 : vector<1x8x1x4xf32> to vector<1x8x4xf32>
    %11 = vector.extract_strided_slice %8 {offsets = [0, 0, 1, 0], sizes = [1, 8, 1, 4], strides = [1, 1, 1, 1]} : vector<1x8x2x4xf32> to vector<1x8x1x4xf32>
    %12 = vector.shape_cast %11 : vector<1x8x1x4xf32> to vector<1x8x4xf32>
    %13 = arith.maximumf %10, %12 : vector<1x8x4xf32>
    %c0_3 = arith.constant 0 : index
    %c0_4 = arith.constant 0 : index
    %c0_5 = arith.constant 0 : index
    %c0_6 = arith.constant 0 : index
    %14 = vector.load %arg2[%c0_3, %c0_4, %c0_5, %c0_6] : memref<1x16x16x4xf32, #tpu.memory_space<vmem>>, vector<1x16x16x4xf32>
    %15 = vector.shape_cast %14 : vector<1x16x16x4xf32> to vector<16x16x4xf32>
    %16 = vector.shape_cast %15 : vector<16x16x4xf32> to vector<8x2x16x4xf32>
    %17 = vector.extract_strided_slice %16 {offsets = [0, 0, 0, 0], sizes = [8, 1, 16, 4], strides = [1, 1, 1, 1]} : vector<8x2x16x4xf32> to vector<8x1x16x4xf32>
    %18 = vector.shape_cast %17 : vector<8x1x16x4xf32> to vector<8x16x4xf32>
    %19 = vector.extract_strided_slice %16 {offsets = [0, 1, 0, 0], sizes = [8, 1, 16, 4], strides = [1, 1, 1, 1]} : vector<8x2x16x4xf32> to vector<8x1x16x4xf32>
    %20 = vector.shape_cast %19 : vector<8x1x16x4xf32> to vector<8x16x4xf32>
    %21 = arith.maximumf %18, %20 : vector<8x16x4xf32>
    %22 = vector.shape_cast %21 : vector<8x16x4xf32> to vector<8x8x2x4xf32>
    %23 = vector.extract_strided_slice %22 {offsets = [0, 0, 0, 0], sizes = [8, 8, 1, 4], strides = [1, 1, 1, 1]} : vector<8x8x2x4xf32> to vector<8x8x1x4xf32>
    %24 = vector.shape_cast %23 : vector<8x8x1x4xf32> to vector<8x8x4xf32>
    %25 = vector.extract_strided_slice %22 {offsets = [0, 0, 1, 0], sizes = [8, 8, 1, 4], strides = [1, 1, 1, 1]} : vector<8x8x2x4xf32> to vector<8x8x1x4xf32>
    %26 = vector.shape_cast %25 : vector<8x8x1x4xf32> to vector<8x8x4xf32>
    %27 = arith.maximumf %24, %26 : vector<8x8x4xf32>
    %c0_7 = arith.constant 0 : index
    %c0_8 = arith.constant 0 : index
    %c0_9 = arith.constant 0 : index
    %c0_10 = arith.constant 0 : index
    %28 = vector.load %arg4[%c0_7, %c0_8, %c0_9, %c0_10] : memref<1x2x16x4xf32, #tpu.memory_space<vmem>>, vector<1x2x16x4xf32>
    %29 = vector.shape_cast %28 : vector<1x2x16x4xf32> to vector<2x16x4xf32>
    %30 = vector.shape_cast %29 : vector<2x16x4xf32> to vector<1x2x16x4xf32>
    %31 = vector.extract_strided_slice %30 {offsets = [0, 0, 0, 0], sizes = [1, 1, 16, 4], strides = [1, 1, 1, 1]} : vector<1x2x16x4xf32> to vector<1x1x16x4xf32>
    %32 = vector.shape_cast %31 : vector<1x1x16x4xf32> to vector<1x16x4xf32>
    %33 = vector.extract_strided_slice %30 {offsets = [0, 1, 0, 0], sizes = [1, 1, 16, 4], strides = [1, 1, 1, 1]} : vector<1x2x16x4xf32> to vector<1x1x16x4xf32>
    %34 = vector.shape_cast %33 : vector<1x1x16x4xf32> to vector<1x16x4xf32>
    %35 = arith.maximumf %32, %34 : vector<1x16x4xf32>
    %36 = vector.shape_cast %35 : vector<1x16x4xf32> to vector<1x8x2x4xf32>
    %37 = vector.extract_strided_slice %36 {offsets = [0, 0, 0, 0], sizes = [1, 8, 1, 4], strides = [1, 1, 1, 1]} : vector<1x8x2x4xf32> to vector<1x8x1x4xf32>
    %38 = vector.shape_cast %37 : vector<1x8x1x4xf32> to vector<1x8x4xf32>
    %39 = vector.extract_strided_slice %36 {offsets = [0, 0, 1, 0], sizes = [1, 8, 1, 4], strides = [1, 1, 1, 1]} : vector<1x8x2x4xf32> to vector<1x8x1x4xf32>
    %40 = vector.shape_cast %39 : vector<1x8x1x4xf32> to vector<1x8x4xf32>
    %41 = arith.maximumf %38, %40 : vector<1x8x4xf32>
    %42 = tpu.concatenate %13, %27, %41 in 0 : vector<1x8x4xf32>, vector<8x8x4xf32>, vector<1x8x4xf32> -> vector<10x8x4xf32>
    %43 = vector.extract_strided_slice %42 {offsets = [0, 0, 0], sizes = [10, 1, 4], strides = [1, 1, 1]} : vector<10x8x4xf32> to vector<10x1x4xf32>
    %44 = vector.extract_strided_slice %42 {offsets = [0, 0, 0], sizes = [10, 7, 4], strides = [1, 1, 1]} : vector<10x8x4xf32> to vector<10x7x4xf32>
    %45 = tpu.concatenate %43, %44 in 1 : vector<10x1x4xf32>, vector<10x7x4xf32> -> vector<10x8x4xf32>
    %46 = vector.extract_strided_slice %42 {offsets = [0, 1, 0], sizes = [10, 7, 4], strides = [1, 1, 1]} : vector<10x8x4xf32> to vector<10x7x4xf32>
    %47 = vector.extract_strided_slice %42 {offsets = [0, 7, 0], sizes = [10, 1, 4], strides = [1, 1, 1]} : vector<10x8x4xf32> to vector<10x1x4xf32>
    %48 = tpu.concatenate %46, %47 in 1 : vector<10x7x4xf32>, vector<10x1x4xf32> -> vector<10x8x4xf32>
    %49 = vector.shape_cast %45 : vector<10x8x4xf32> to vector<80x4xf32>
    %50 = vector.shape_cast %42 : vector<10x8x4xf32> to vector<80x4xf32>
    %51 = vector.shape_cast %48 : vector<10x8x4xf32> to vector<80x4xf32>
    %52 = vector.extract_strided_slice %49 {offsets = [0, 0], sizes = [64, 4], strides = [1, 1]} : vector<80x4xf32> to vector<64x4xf32>
    %c0_11 = arith.constant 0 : index
    %c0_12 = arith.constant 0 : index
    %c0_13 = arith.constant 0 : index
    %53 = vector.load %arg5[%c0_11, %c0_12, %c0_13] : memref<9x4x8xf32, #tpu.memory_space<vmem>>, vector<1x4x8xf32>
    %54 = vector.shape_cast %53 : vector<1x4x8xf32> to vector<4x8xf32>
    %cst = arith.constant dense<0.000000e+00> : vector<64x8xf32>
    %55 = tpu.matmul %52, %54, %cst {dimension_numbers = #tpu.dot_dimension_numbers<[1], [0], [0], [1], [0, 0, 1, 1], [], []>} : vector<64x4xf32>, vector<4x8xf32>, vector<64x8xf32> -> vector<64x8xf32>
    %56 = vector.extract_strided_slice %50 {offsets = [0, 0], sizes = [64, 4], strides = [1, 1]} : vector<80x4xf32> to vector<64x4xf32>
    %c1 = arith.constant 1 : index
    %c0_14 = arith.constant 0 : index
    %c0_15 = arith.constant 0 : index
    %57 = vector.load %arg5[%c1, %c0_14, %c0_15] : memref<9x4x8xf32, #tpu.memory_space<vmem>>, vector<1x4x8xf32>
    %58 = vector.shape_cast %57 : vector<1x4x8xf32> to vector<4x8xf32>
    %cst_16 = arith.constant dense<0.000000e+00> : vector<64x8xf32>
    %59 = tpu.matmul %56, %58, %cst_16 {dimension_numbers = #tpu.dot_dimension_numbers<[1], [0], [0], [1], [0, 0, 1, 1], [], []>} : vector<64x4xf32>, vector<4x8xf32>, vector<64x8xf32> -> vector<64x8xf32>
    %60 = arith.addf %55, %59 : vector<64x8xf32>
    %61 = vector.extract_strided_slice %51 {offsets = [0, 0], sizes = [64, 4], strides = [1, 1]} : vector<80x4xf32> to vector<64x4xf32>
    %c2 = arith.constant 2 : index
    %c0_17 = arith.constant 0 : index
    %c0_18 = arith.constant 0 : index
    %62 = vector.load %arg5[%c2, %c0_17, %c0_18] : memref<9x4x8xf32, #tpu.memory_space<vmem>>, vector<1x4x8xf32>
    %63 = vector.shape_cast %62 : vector<1x4x8xf32> to vector<4x8xf32>
    %cst_19 = arith.constant dense<0.000000e+00> : vector<64x8xf32>
    %64 = tpu.matmul %61, %63, %cst_19 {dimension_numbers = #tpu.dot_dimension_numbers<[1], [0], [0], [1], [0, 0, 1, 1], [], []>} : vector<64x4xf32>, vector<4x8xf32>, vector<64x8xf32> -> vector<64x8xf32>
    %65 = arith.addf %60, %64 : vector<64x8xf32>
    %66 = vector.extract_strided_slice %49 {offsets = [8, 0], sizes = [64, 4], strides = [1, 1]} : vector<80x4xf32> to vector<64x4xf32>
    %c3 = arith.constant 3 : index
    %c0_20 = arith.constant 0 : index
    %c0_21 = arith.constant 0 : index
    %67 = vector.load %arg5[%c3, %c0_20, %c0_21] : memref<9x4x8xf32, #tpu.memory_space<vmem>>, vector<1x4x8xf32>
    %68 = vector.shape_cast %67 : vector<1x4x8xf32> to vector<4x8xf32>
    %cst_22 = arith.constant dense<0.000000e+00> : vector<64x8xf32>
    %69 = tpu.matmul %66, %68, %cst_22 {dimension_numbers = #tpu.dot_dimension_numbers<[1], [0], [0], [1], [0, 0, 1, 1], [], []>} : vector<64x4xf32>, vector<4x8xf32>, vector<64x8xf32> -> vector<64x8xf32>
    %70 = arith.addf %65, %69 : vector<64x8xf32>
    %71 = vector.extract_strided_slice %50 {offsets = [8, 0], sizes = [64, 4], strides = [1, 1]} : vector<80x4xf32> to vector<64x4xf32>
    %c4 = arith.constant 4 : index
    %c0_23 = arith.constant 0 : index
    %c0_24 = arith.constant 0 : index
    %72 = vector.load %arg5[%c4, %c0_23, %c0_24] : memref<9x4x8xf32, #tpu.memory_space<vmem>>, vector<1x4x8xf32>
    %73 = vector.shape_cast %72 : vector<1x4x8xf32> to vector<4x8xf32>
    %cst_25 = arith.constant dense<0.000000e+00> : vector<64x8xf32>
    %74 = tpu.matmul %71, %73, %cst_25 {dimension_numbers = #tpu.dot_dimension_numbers<[1], [0], [0], [1], [0, 0, 1, 1], [], []>} : vector<64x4xf32>, vector<4x8xf32>, vector<64x8xf32> -> vector<64x8xf32>
    %75 = arith.addf %70, %74 : vector<64x8xf32>
    %76 = vector.extract_strided_slice %51 {offsets = [8, 0], sizes = [64, 4], strides = [1, 1]} : vector<80x4xf32> to vector<64x4xf32>
    %c5 = arith.constant 5 : index
    %c0_26 = arith.constant 0 : index
    %c0_27 = arith.constant 0 : index
    %77 = vector.load %arg5[%c5, %c0_26, %c0_27] : memref<9x4x8xf32, #tpu.memory_space<vmem>>, vector<1x4x8xf32>
    %78 = vector.shape_cast %77 : vector<1x4x8xf32> to vector<4x8xf32>
    %cst_28 = arith.constant dense<0.000000e+00> : vector<64x8xf32>
    %79 = tpu.matmul %76, %78, %cst_28 {dimension_numbers = #tpu.dot_dimension_numbers<[1], [0], [0], [1], [0, 0, 1, 1], [], []>} : vector<64x4xf32>, vector<4x8xf32>, vector<64x8xf32> -> vector<64x8xf32>
    %80 = arith.addf %75, %79 : vector<64x8xf32>
    %81 = vector.extract_strided_slice %49 {offsets = [16, 0], sizes = [64, 4], strides = [1, 1]} : vector<80x4xf32> to vector<64x4xf32>
    %c6 = arith.constant 6 : index
    %c0_29 = arith.constant 0 : index
    %c0_30 = arith.constant 0 : index
    %82 = vector.load %arg5[%c6, %c0_29, %c0_30] : memref<9x4x8xf32, #tpu.memory_space<vmem>>, vector<1x4x8xf32>
    %83 = vector.shape_cast %82 : vector<1x4x8xf32> to vector<4x8xf32>
    %cst_31 = arith.constant dense<0.000000e+00> : vector<64x8xf32>
    %84 = tpu.matmul %81, %83, %cst_31 {dimension_numbers = #tpu.dot_dimension_numbers<[1], [0], [0], [1], [0, 0, 1, 1], [], []>} : vector<64x4xf32>, vector<4x8xf32>, vector<64x8xf32> -> vector<64x8xf32>
    %85 = arith.addf %80, %84 : vector<64x8xf32>
    %86 = vector.extract_strided_slice %50 {offsets = [16, 0], sizes = [64, 4], strides = [1, 1]} : vector<80x4xf32> to vector<64x4xf32>
    %c7 = arith.constant 7 : index
    %c0_32 = arith.constant 0 : index
    %c0_33 = arith.constant 0 : index
    %87 = vector.load %arg5[%c7, %c0_32, %c0_33] : memref<9x4x8xf32, #tpu.memory_space<vmem>>, vector<1x4x8xf32>
    %88 = vector.shape_cast %87 : vector<1x4x8xf32> to vector<4x8xf32>
    %cst_34 = arith.constant dense<0.000000e+00> : vector<64x8xf32>
    %89 = tpu.matmul %86, %88, %cst_34 {dimension_numbers = #tpu.dot_dimension_numbers<[1], [0], [0], [1], [0, 0, 1, 1], [], []>} : vector<64x4xf32>, vector<4x8xf32>, vector<64x8xf32> -> vector<64x8xf32>
    %90 = arith.addf %85, %89 : vector<64x8xf32>
    %91 = vector.extract_strided_slice %51 {offsets = [16, 0], sizes = [64, 4], strides = [1, 1]} : vector<80x4xf32> to vector<64x4xf32>
    %c8 = arith.constant 8 : index
    %c0_35 = arith.constant 0 : index
    %c0_36 = arith.constant 0 : index
    %92 = vector.load %arg5[%c8, %c0_35, %c0_36] : memref<9x4x8xf32, #tpu.memory_space<vmem>>, vector<1x4x8xf32>
    %93 = vector.shape_cast %92 : vector<1x4x8xf32> to vector<4x8xf32>
    %cst_37 = arith.constant dense<0.000000e+00> : vector<64x8xf32>
    %94 = tpu.matmul %91, %93, %cst_37 {dimension_numbers = #tpu.dot_dimension_numbers<[1], [0], [0], [1], [0, 0, 1, 1], [], []>} : vector<64x4xf32>, vector<4x8xf32>, vector<64x8xf32> -> vector<64x8xf32>
    %95 = arith.addf %90, %94 : vector<64x8xf32>
    %c0_38 = arith.constant 0 : index
    %c0_39 = arith.constant 0 : index
    %96 = vector.load %arg6[%c0_38, %c0_39] : memref<1x8xf32, #tpu.memory_space<vmem>>, vector<1x8xf32>
    %97 = vector.broadcast %96 : vector<1x8xf32> to vector<64x8xf32>
    %98 = arith.addf %95, %97 : vector<64x8xf32>
    %cst_40 = arith.constant 0.000000e+00 : f32
    %99 = vector.broadcast %cst_40 : f32 to vector<64x8xf32>
    %100 = arith.maximumf %98, %99 : vector<64x8xf32>
    %101 = vector.shape_cast %100 : vector<64x8xf32> to vector<8x8x8xf32>
    %c0_41 = arith.constant 0 : index
    %c0_42 = arith.constant 0 : index
    %c0_43 = arith.constant 0 : index
    %c0_44 = arith.constant 0 : index
    %102 = vector.load %arg7[%c0_41, %c0_42, %c0_43, %c0_44] : memref<1x8x8x8xf32, #tpu.memory_space<vmem>>, vector<1x8x8x8xf32>
    %103 = vector.shape_cast %102 : vector<1x8x8x8xf32> to vector<8x8x8xf32>
    %104 = vector.shape_cast %101 : vector<8x8x8xf32> to vector<1x8x8x8xf32>
    tpu.vector_store %arg7[%c0_41, %c0_42, %c0_43, %c0_44], %104 {strides = array<i32>} : memref<1x8x8x8xf32, #tpu.memory_space<vmem>>, vector<1x8x8x8xf32>,
    return
  }
  func.func @transform_0(%arg0: i32, %arg1: i32) -> (i32, i32, i32, i32) {
    %c0_i32 = arith.constant 0 : i32
    %c0_i32_0 = arith.constant 0 : i32
    %c0_i32_1 = arith.constant 0 : i32
    return %arg0, %arg1, %c0_i32, %c0_i32_0 : i32, i32, i32, i32
  }
  func.func @transform_1(%arg0: i32, %arg1: i32) -> (i32, i32, i32, i32) {
    %c8_i32 = arith.constant 8 : i32
    %0 = arith.muli %arg1, %c8_i32 : i32
    %c1_i32 = arith.constant 1 : i32
    %1 = arith.subi %0, %c1_i32 : i32
    %c0_i32 = arith.constant 0 : i32
    %2 = arith.maxsi %1, %c0_i32 : i32
    %c0_i32_0 = arith.constant 0 : i32
    %c0_i32_1 = arith.constant 0 : i32
    %c0_i32_2 = arith.constant 0 : i32
    return %arg0, %2, %c0_i32_0, %c0_i32_1 : i32, i32, i32, i32
  }
  func.func @transform_2(%arg0: i32, %arg1: i32) -> (i32, i32, i32, i32) {
    %c1_i32 = arith.constant 1 : i32
    %0 = arith.addi %arg1, %c1_i32 : i32
    %c8_i32 = arith.constant 8 : i32
    %1 = arith.muli %0, %c8_i32 : i32
    %c7_i32 = arith.constant 7 : i32
    %2 = arith.minsi %1, %c7_i32 : i32
    %c0_i32 = arith.constant 0 : i32
    %c0_i32_0 = arith.constant 0 : i32
    %c0_i32_1 = arith.constant 0 : i32
    return %arg0, %2, %c0_i32, %c0_i32_0 : i32, i32, i32, i32
  }
  func.func @transform_3(%arg0: i32, %arg1: i32) -> (i32, i32, i32) {
    %c0_i32 = arith.constant 0 : i32
    %c0_i32_0 = arith.constant 0 : i32
    %c0_i32_1 = arith.constant 0 : i32
    %c0_i32_2 = arith.constant 0 : i32
    return %c0_i32, %c0_i32_0, %c0_i32_1 : i32, i32, i32
  }
  func.func @transform_4(%arg0: i32, %arg1: i32) -> (i32, i32) {
    %c0_i32 = arith.constant 0 : i32
    %c0_i32_0 = arith.constant 0 : i32
    %c0_i32_1 = arith.constant 0 : i32
    return %c0_i32, %c0_i32_0 : i32, i32
  }
  func.func @transform_5(%arg0: i32, %arg1: i32) -> (i32, i32, i32, i32) {
    %c0_i32 = arith.constant 0 : i32
    %c0_i32_0 = arith.constant 0 : i32
    %c0_i32_1 = arith.constant 0 : i32
    return %arg0, %arg1, %c0_i32, %c0_i32_0 : i32, i32, i32, i32
  }
}

</mosaic_0001>

<bundles_post_ra>
// kernel: tpu_custom_call.1
= control target key start
LH: loop header
LB: loop body
LE: loop exit
PB: predicated region body
PF: predicated region fallthrough
CT: control target
= control target key end

     0   :  { %10 = vsyncpa [#allocation3], 0  ;;  %s4965_s0 = inlined_call_operand.vmem [shape: f32[2,16,16,4], index: 0, kind: input, shape index: {}]   ;;  %s4966_s1 = inlined_call_operand.vmem [shape: f32[2,16,16,4], index: 1, kind: input, shape index: {}]   ;;  %s4967_s2 = inlined_call_operand.vmem [shape: f32[2,16,16,4], index: 2, kind: input, shape index: {}]   ;;  %s4968_s3 = inlined_call_operand.vmem [shape: f32[9,4,8], index: 3, kind: input, shape index: {}]   ;;  %s4969_s4 = inlined_call_operand.vmem [shape: f32[1,8], index: 4, kind: input, shape index: {}]   ;;  %s4970_s5 = inlined_call_operand.hbm [shape: f32[2,8,8,8], index: 5, kind: output, shape index: {}]  }
   0x1   :  { %12 = vsyncpa [#allocation3 + $0x1], 0  ;;  %s3798_s18 = smov 0   ;;  %s3800_s19 = smov 0  }
   0x2   :  { %s3802_s20 = smov 0   ;;  %s3804_s21 = smov 0  }
   0x3   :  { %s3806_s22 = smov 0   ;;  %s3808_s23 = smov 0  }
   0x4 LB: > { %s3159_s24 = sadd.s32 4294967295, %s3762_s23   ;;  %s3160_s25 = sadd.s32 4294967294, %s3762_s23   ;;  %s3762_s23 = sphi %s3808_s23, %s18_s23   ;;  %s3758_s22 = sphi %s3806_s22, %s5088_s22   ;;  %s3754_s21 = sphi %s3804_s21, %s5087_s21   ;;  %s3750_s20 = sphi %s3802_s20, %s5086_s20   ;;  %s3746_s19 = sphi %s3800_s19, %s5085_s19   ;;  %s3742_s18 = sphi %s3798_s18, %s5084_s18  }
   0x5   : > { %s30_s26 = sadd.s32 1, %s3758_s22  ;;  %s181_s27 = sadd.s32 1, %s3750_s20 }
   0x6   : > { %p32_p0 = scmp.ge.s32.totalorder %s30_s26, 2  ;;  %p191_p1 = scmp.ne.s32.totalorder %s3750_s20, %s3746_s19 }
   0x7   : > { %p192_p2 = scmp.eq.s32.totalorder %s3159_s24, 1  ;;  %p197_p3 = scmp.ne.s32.totalorder %s3746_s19, %s3742_s18 }
   0x8   : > { %s5090_s26 = smov (%p32_p0, %s30_s26), 0  ;;  %p198_p5 = scmp.eq.s32.totalorder %s3160_s25, 1 }
   0x9   : > { %p3838_p4 = por %p192_p2, %p191_p1  ;;  %s176_s29 = ssub.s32 %s3758_s22, %s5090_s26 }
   0xa   : > { %p3163_p6 = scmp.ge.s32.totalorder %s3762_s23, 1  ;;  %p179_p7 = scmp.eq.s32.totalorder %s176_s29, 0 }
   0xb   : > { %p3845_p8 = por %p198_p5, %p197_p3  ;;  %p280_p9 = scmp.lt.s32.totalorder %s3762_s23, 3 }
   0xc   : > { %s3851_s6 = scalar_select %p179_p7, %s3750_s20, %s181_s27  }
   0xd   : > { %p281_p10 = pnand %p3163_p6, %p280_p9 }
   0xf   : > { %284 = sbr.rel (%p281_p10) target bundleno = 441 (0x1b9), region = 40 }
  0x16   : > { %v3251_v0 = vld [vmem:[%s4968_s3 + $0x4] sm:$0xf]  ;;  %vm1866_vm0 = vcmask 1043456   ;;  %v3290_v1 = vld [vmem:[%s4968_s3 + $0x10] sm:$0xf]  ;;  %p342_p11 = scmp.lt.s32.totalorder %s3754_s21, 1  ;;  %v403_v2 = vlaneseq }
  0x17   : > { %3433 = vmatprep.subr.msk.mxu1 %vm1866_vm0, %v3251_v0  ;;  %3489 = vmatprep.subr.msk.mxu0 %vm1866_vm0, %v3290_v1  ;;  %v3764_v3 = vmov 1983009808   ;;  %v3868_v6 = vld [vmem:[%s4968_s3] sm:$0xf]  ;;  %v3875_v7 = vld [vmem:[%s4968_s3 + $0x14] sm:$0xf] }
  0x18   : > { %3434 = vmatpush3.msk.msra.mxu1 %vm1866_vm0, %v3251_v0  ;;  %3490 = vmatpush3.msk.msra.mxu0 %vm1866_vm0, %v3290_v1  ;;  %s343_s11 = scalar_select %p342_p11, %s3754_s21, 1  ;;  %v401_v4 = vunpack.c.l.s4 %v3764_v3  ;;  %v404_v5 = vshrl.u32 %v403_v2, 7  ;;  %vm1698_vm1 = vcmask 1041409   ;;  %vm1561_vm2 = vcmask 1042434  }
  0x19   : > { %3447 = vmatprep.subr.msk.mxu1 %vm1866_vm0, %v3868_v6  ;;  %3503 = vmatprep.subr.msk.mxu0 %vm1866_vm0, %v3875_v7  ;;  %vm1563_vm3 = vcmask 1043459   ;;  %vm1565_vm4 = vcmask 1044484   ;;  %vm1567_vm5 = vcmask 1045509   ;;  %vm1569_vm6 = vcmask 1046534   ;;  %s338_s9 = sand.u32 1, %s3746_s19   ;;  %s3350_s14 = sshll.u32 %s3754_s21, 10 }
  0x1a   : > { %s3877_s16 = sshll.u32 %s343_s11, 8  ;;  %v402_v8 = vunpack.c.0.s8 %v401_v4  ;;  %v3895_v18 = vsub.s32 0, %v404_v5  ;;  %vm1571_vm7 = vcmask 1047559   ;;  %vm1849_vm8 = vcmask 31744   ;;  %s3164_s12 = sshll.u32 %s338_s9, 6 }
  0x1b   : > { %s3885_s25 = scalar_lea.vmem %s4965_s0, %s3877_s16  ;;  %s365_s7 = scalar_lea.vmem %s4966_s1, %s3877_s16  ;;  %vm1779_vm9 = vcmask 1046528   ;;  %vm1637_vm10 = vcmask 1040384   ;;  %vm3010_vm11 = vcmask 64512  }
  0x1c   : > { %v391_v9 = vld [vmem:[%s365_s7] sm:$0xff]  ;;  %v392_v10 = vld [vmem:[%s365_s7 + $0x8] sm:$0xff]  ;;  %v393_v11 = vld [vmem:[%s365_s7 + $0x10] sm:$0xff]  ;;  %v3891_v12 = vsub.s32 %v402_v8, %v404_v5  ;;  %s3349_s17 = sadd.s32 224, %s3877_s16  ;;  %s4890_s13 = scalar_lea.vmem [#allocation2], %s3164_s12 }
  0x1d   : > { %v394_v13 = vld [vmem:[%s365_s7 + $0x18] sm:$0xff]  ;;  %v395_v14 = vmax.f32 %v391_v9, %v393_v11  ;;  %v473_v15 = vld [vmem:[%s3885_s25] sm:$0xff]  ;;  %v474_v16 = vld [vmem:[%s3885_s25 + $0x8] sm:$0xff]  ;;  %s3035_s15 = sshll.u32 %s4890_s13, 4  ;;  %s4909_s24 = scalar_lea.hbm %s4970_s5, %s3350_s14  ;;  %s4911_s15 = int_to_ptr.vmem [resolvable:$true] %s3035_s15 }
  0x1e   : > { %5014 = vst [vmem:[#allocation5_spill] sm:$0xff] %v3891_v12  ;;  %v396_v17 = vmax.f32 %v392_v10, %v394_v13  ;;  %v475_v19 = vld [vmem:[%s3885_s25 + $0x10] sm:$0xff]  ;;  %v476_v20 = vld [vmem:[%s3885_s25 + $0x18] sm:$0xff]  ;;  %v477_v21 = vld [vmem:[%s3885_s25 + $0x20] sm:$0xff]  ;;  %s4919_s21 = scalar_lea.sflag [#allocation3], %s338_s9  ;;  %s3765_s27 = smov [#allocation2]  }
  0x1f   : > { %v399_v22 = vcombine.high %v395_v14, %v395_v14  ;;  %v406_v23 = vrot.slane %v395_v14, %v3891_v12  ;;  %v505_v24 = vmax.f32 %v473_v15, %v475_v19  ;;  %v506_v25 = vmax.f32 %v474_v16, %v476_v20  ;;  %v478_v26 = vld [vmem:[%s3885_s25 + $0x28] sm:$0xff]  ;;  %v479_v27 = vld [vmem:[%s3885_s25 + $0x30] sm:$0xff]  ;;  %v480_v28 = vld [vmem:[%s3885_s25 + $0x38] sm:$0xff]  ;;  %s3688_s29 = sshll.u32 %s3765_s27, 4  ;;  %s3689_s29 = int_to_ptr.vmem [resolvable:$false] %s3688_s29 }
  0x20   : > { %v416_v29 = vcombine.high %v396_v17, %v396_v17  ;;  %v423_v30 = vrot.slane %v396_v17, %v3891_v12  ;;  %v3905_v31 = vmax.f32 %v477_v21, %v479_v27  ;;  %v3907_v32 = vmax.f32 %v478_v26, %v480_v28  ;;  %s3690_s7 = scalar_lea.vmem %s3689_s29, 2048  ;;  %p3691_p1 = scmp.lt.s32.totalorder %s4911_s15, %s3689_s29 }
  0x21   : > { %v413_v33 = vrot.slane %v399_v22, %v3891_v12  ;;  %v414_v34 = vcombine.high %v406_v23, %v406_v23  ;;  %v3171_v35 = vrot.slane %v406_v23, 9  ;;  %v537_v36 = vcombine.high %v505_v24, %v505_v24 }
  0x22   : > { %v430_v37 = vrot.slane %v416_v29, %v3891_v12  ;;  %v431_v38 = vcombine.high %v423_v30, %v423_v30  ;;  %v3175_v39 = vrot.slane %v423_v30, 9  ;;  %v544_v40 = vrot.slane %v505_v24, %v3891_v12 }
  0x23   : > { %v415_v41 = vcombine.high %v413_v33, %v413_v33  ;;  %v3172_v42 = vrot.slane %v414_v34, 9  ;;  %v3173_v43 = vrot.slane %v413_v33, 9  ;;  %v3912_v44 = vmax.f32 %v406_v23, %v3171_v35 }
  0x24   : > { %v432_v45 = vcombine.high %v430_v37, %v430_v37  ;;  %v3176_v46 = vrot.slane %v431_v38, 9  ;;  %v3177_v47 = vrot.slane %v430_v37, 9  ;;  %v469_v48 = vmax.f32 %v423_v30, %v3175_v39 }
  0x25   : > { %v3174_v49 = vrot.slane %v415_v41, 9  ;;  %v466_v50 = vmax.f32 %v414_v34, %v3172_v42  ;;  %v467_v51 = vmax.f32 %v413_v33, %v3173_v43  ;;  %v3916_v52 = vrot.slane %v3912_v44, %v3895_v18  ;;  %v481_v43 = vld [vmem:[%s3885_s25 + $0x40] sm:$0xff] }
  0x26   : > { %v3178_v53 = vrot.slane %v432_v45, 9  ;;  %v470_v54 = vmax.f32 %v431_v38, %v3176_v46  ;;  %v471_v55 = vmax.f32 %v430_v37, %v3177_v47  ;;  %v3919_v56 = vrot.slane %v469_v48, %v3895_v18 }
  0x27   : > { %v468_v57 = vmax.f32 %v415_v41, %v3174_v49  ;;  %v3922_v58 = vrot.slane %v466_v50, %v3895_v18  ;;  %v3925_v59 = vrot.slane %v467_v51, %v3895_v18  ;;  %v551_v60 = vrot.slane %v537_v36, %v3891_v12 }
  0x28   : > { %v472_v61 = vmax.f32 %v432_v45, %v3178_v53  ;;  %v3929_v62 = vrot.slane %v470_v54, %v3895_v18  ;;  %v3932_v63 = vrot.slane %v471_v55, %v3895_v18  ;;  %v552_v0 = vcombine.high %v544_v40, %v544_v40  ;;  %v483_v45 = vld [vmem:[%s3885_s25 + $0x50] sm:$0xff] }
  0x29   : > { %v3935_v1 = vrot.slane %v468_v57, %v3895_v18  ;;  %v1793_v2 = vsel %vm1698_vm1, %v3922_v58, %v3916_v52  ;;  %v553_v3 = vcombine.high %v551_v60, %v551_v60  ;;  %v554_v4 = vcombine.high %v506_v25, %v506_v25 }
  0x2a   : > { %v3941_v5 = vrot.slane %v472_v61, %v3895_v18  ;;  %v1794_v8 = vsel %vm1561_vm2, %v3925_v59, %v1793_v2  ;;  %v561_v9 = vrot.slane %v506_v25, %v3891_v12  ;;  %v3179_v10 = vrot.slane %v544_v40, 9 }
  0x2b   : > { %v1795_v11 = vsel %vm1563_vm3, %v3935_v1, %v1794_v8  ;;  %v568_v13 = vrot.slane %v554_v4, %v3891_v12  ;;  %v3180_v14 = vrot.slane %v552_v0, 9  ;;  %v3181_v15 = vrot.slane %v551_v60, 9 }
  0x2c   : > { %5015 = vst [vmem:[#allocation6_spill] sm:$0xff] %v3941_v5  ;;  %v1796_v16 = vsel %vm1565_vm4, %v3919_v56, %v1795_v11  ;;  %v569_v17 = vcombine.high %v561_v9, %v561_v9  ;;  %v3182_v19 = vrot.slane %v553_v3, 9  ;;  %v3183_v20 = vrot.slane %v561_v9, 9 }
  0x2d   : > { %v1797_v21 = vsel %vm1567_vm5, %v3929_v62, %v1796_v16  ;;  %v570_v22 = vcombine.high %v568_v13, %v568_v13  ;;  %v3185_v23 = vrot.slane %v568_v13, 9  ;;  %v3953_v24 = vmax.f32 %v544_v40, %v3179_v10 }
  0x2e   : > { %v1798_v25 = vsel %vm1569_vm6, %v3932_v63, %v1797_v21  ;;  %v3184_v26 = vrot.slane %v569_v17, 9  ;;  %v1066_v27 = vmax.f32 %v552_v0, %v3180_v14  ;;  %v1067_v28 = vmax.f32 %v551_v60, %v3181_v15 }
  0x2f   : > { %5016 = vst [vmem:[#allocation7_spill] sm:$0xff] %v3953_v24  ;;  %v1799_v29 = vsel %vm1571_vm7, %v3941_v5, %v1798_v25  ;;  %v3186_v30 = vrot.slane %v570_v22, 9  ;;  %v1068_v33 = vmax.f32 %v553_v3, %v3182_v19  ;;  %v1069_v34 = vmax.f32 %v561_v9, %v3183_v20  ;;  %v4015_v20 = vld [vmem:[%s4968_s3 + $0x8] sm:$0xf]  ;;  %v489_v5 = vld [vmem:[%s3885_s25 + $0x80] sm:$0xff] }
  0x30   : > { %3435 = vmatprep.mubr.msk.f32.mxu1 %vm1849_vm8, %v1799_v29  ;;  %v1070_v35 = vmax.f32 %v569_v17, %v3184_v26  ;;  %v1071_v36 = vmax.f32 %v568_v13, %v3185_v23  ;;  %v3962_v37 = vrot.slane %v3953_v24, %v3895_v18  ;;  %v3965_v38 = vrot.slane %v1066_v27, %v3895_v18 }
  0x31   : > { %v1072_v39 = vmax.f32 %v570_v22, %v3186_v30  ;;  %v3968_v40 = vrot.slane %v1067_v28, %v3895_v18  ;;  %v3971_v41 = vrot.slane %v1068_v33, %v3895_v18  ;;  %v3974_v42 = vrot.slane %v1069_v34, %v3895_v18  ;;  %5020 = vst [vmem:[#allocation11_spill] sm:$0xff] %v4015_v20  ;;  %v482_v30 = vld [vmem:[%s3885_s25 + $0x48] sm:$0xff]  ;;  %v484_v33 = vld [vmem:[%s3885_s25 + $0x58] sm:$0xff]  ;;  %v485_v34 = vld [vmem:[%s3885_s25 + $0x60] sm:$0xff] }
  0x32   : > { %v3979_v46 = vrot.slane %v1070_v35, %v3895_v18  ;;  %v3982_v47 = vrot.slane %v1071_v36, %v3895_v18  ;;  %v1800_v48 = vsel %vm1698_vm1, %v3965_v38, %v3962_v37  ;;  %v571_v49 = vcombine.high %v3905_v31, %v3905_v31 }
  0x33   : > { %5017 = vst [vmem:[#allocation8_spill] sm:$0xff] %v3974_v42  ;;  %v3990_v50 = vrot.slane %v1072_v39, %v3895_v18  ;;  %v1801_v51 = vsel %vm1561_vm2, %v3968_v40, %v1800_v48  ;;  %v578_v53 = vrot.slane %v3905_v31, %v3891_v12  ;;  %v588_v54 = vcombine.high %v3907_v32, %v3907_v32  ;;  %v488_v48 = vld [vmem:[%s3885_s25 + $0x78] sm:$0xff] }
  0x34   : > { %5018 = vst [vmem:[#allocation9_spill] sm:$0xff] %v3979_v46  ;;  %5019 = vst [vmem:[#allocation10_spill] sm:$0xff] %v3982_v47  ;;  %v1802_v55 = vsel %vm1563_vm3, %v3971_v41, %v1801_v51  ;;  %v585_v57 = vrot.slane %v571_v49, %v3891_v12  ;;  %v595_v60 = vrot.slane %v3907_v32, %v3891_v12 }
  0x35   : > { %v509_v61 = vmax.f32 %v481_v43, %v483_v45  ;;  %v1803_v0 = vsel %vm1565_vm4, %v3974_v42, %v1802_v55  ;;  %v586_v2 = vcombine.high %v578_v53, %v578_v53  ;;  %v602_v3 = vrot.slane %v588_v54, %v3891_v12  ;;  %v486_v45 = vld [vmem:[%s3885_s25 + $0x68] sm:$0xff] }
  0x36   : > { %v3187_v4 = vrot.slane %v578_v53, 9  ;;  %v1804_v31 = vsel %vm1567_vm5, %v3979_v46, %v1803_v0  ;;  %v587_v8 = vcombine.high %v585_v57, %v585_v57  ;;  %v603_v9 = vcombine.high %v595_v60, %v595_v60 }
  0x37   : > { %v3189_v10 = vrot.slane %v585_v57, 9  ;;  %v1805_v11 = vsel %vm1569_vm6, %v3982_v47, %v1804_v31  ;;  %v604_v13 = vcombine.high %v602_v3, %v602_v3  ;;  %v3188_v14 = vrot.slane %v586_v2, 9 }
  0x38   : > { %v3191_v32 = vrot.slane %v595_v60, 9  ;;  %v1806_v15 = vsel %vm1571_vm7, %v3990_v50, %v1805_v11  ;;  %v3190_v16 = vrot.slane %v587_v8, 9  ;;  %v3192_v17 = vrot.slane %v603_v9, 9 }
  0x39   : > { %v3193_v19 = vrot.slane %v602_v3, 9  ;;  %3491 = vmatprep.mubr.msk.f32.mxu0 %vm1849_vm8, %v1806_v15  ;;  %3436 = vmatmul.mubr.msk.f32.vlgmr.msra.gmra.mrb[0].mxu1 %vm1849_vm8, %v1806_v15  ;;  %v3194_v21 = vrot.slane %v604_v13, 9  ;;  %v4019_v22 = vmax.f32 %v578_v53, %v3187_v4  ;;  %v1074_v23 = vmax.f32 %v586_v2, %v3188_v14 }
  0x3a   : > { %v1075_v25 = vmax.f32 %v585_v57, %v3189_v10  ;;  %3448 = vmatpush3.msk.msra.mxu1 %vm1866_vm0, %v3868_v6  ;;  %v1076_v26 = vmax.f32 %v587_v8, %v3190_v16  ;;  %v1077_v27 = vmax.f32 %v595_v60, %v3191_v32  ;;  %v1078_v28 = vmax.f32 %v603_v9, %v3192_v17  ;;  %v487_v6 = vld [vmem:[%s3885_s25 + $0x70] sm:$0xff] }
  0x3b   : > { %5021 = vst [vmem:[#allocation12_spill] sm:$0xff] %v4019_v22  ;;  %v1079_v29 = vmax.f32 %v602_v3, %v3193_v19  ;;  %v1080_v35 = vmax.f32 %v604_v13, %v3194_v21  ;;  %v4028_v36 = vrot.slane %v4019_v22, %v3895_v18  ;;  %v4031_v39 = vrot.slane %v1074_v23, %v3895_v18 }
  0x3c   : > { %v4034_v43 = vrot.slane %v1075_v25, %v3895_v18  ;;  %3461 = vmatprep.subr.msk.mxu1 %vm1866_vm0, %v4015_v20  ;;  %v4042_v49 = vrot.slane %v1076_v26, %v3895_v18  ;;  %v4045_v51 = vrot.slane %v1077_v27, %v3895_v18  ;;  %v4048_v53 = vrot.slane %v1078_v28, %v3895_v18 }
  0x3d   : > { %5022 = vst [vmem:[#allocation13_spill] sm:$0xff] %v4028_v36  ;;  %v4051_v54 = vrot.slane %v1079_v29, %v3895_v18  ;;  %v4054_v55 = vrot.slane %v1080_v35, %v3895_v18  ;;  %v1807_v57 = vsel %vm1698_vm1, %v4031_v39, %v4028_v36  ;;  %v510_v60 = vmax.f32 %v482_v30, %v484_v33  ;;  %v4080_v33 = vld [vmem:[%s4968_s3 + $0x18] sm:$0xf] }
  0x3e   : > { %5023 = vst [vmem:[#allocation14_spill] sm:$0xff] %v4048_v53  ;;  %v605_v0 = vcombine.high %v509_v61, %v509_v61  ;;  %v1808_v2 = vsel %vm1561_vm2, %v4034_v43, %v1807_v57  ;;  %v612_v3 = vrot.slane %v509_v61, %v3891_v12  ;;  %v511_v4 = vmax.f32 %v485_v34, %v487_v6 }
  0x3f   : > { %5024 = vst [vmem:[#allocation15_spill] sm:$0xff] %v4051_v54  ;;  %v512_v31 = vmax.f32 %v486_v45, %v488_v48  ;;  %v1809_v8 = vsel %vm1563_vm3, %v4042_v49, %v1808_v2  ;;  %v622_v10 = vcombine.high %v510_v60, %v510_v60  ;;  %v629_v11 = vrot.slane %v510_v60, %v3891_v12 }
  0x40   : > { %v619_v9 = vrot.slane %v605_v0, %v3891_v12  ;;  %v1810_v13 = vsel %vm1565_vm4, %v4045_v51, %v1809_v8  ;;  %v620_v14 = vcombine.high %v612_v3, %v612_v3  ;;  %v3195_v32 = vrot.slane %v612_v3, 9 }
  0x41   : > { %v639_v15 = vcombine.high %v511_v4, %v511_v4  ;;  %v1811_v16 = vsel %vm1567_vm5, %v4048_v53, %v1810_v13  ;;  %v636_v17 = vrot.slane %v622_v10, %v3891_v12  ;;  %v637_v19 = vcombine.high %v629_v11, %v629_v11 }
  0x42   : > { %v621_v61 = vcombine.high %v619_v9, %v619_v9  ;;  %v1812_v21 = vsel %vm1569_vm6, %v4051_v54, %v1811_v16  ;;  %v3196_v23 = vrot.slane %v620_v14, 9  ;;  %v3197_v25 = vrot.slane %v619_v9, 9 }
  0x43   : > { %v3199_v26 = vrot.slane %v629_v11, 9  ;;  %v4075_v27 = vsel %vm1571_vm7, %v4054_v55, %v1812_v21  ;;  %v638_v28 = vcombine.high %v636_v17, %v636_v17  ;;  %v3200_v30 = vrot.slane %v637_v19, 9 }
  0x44   : > { %5025 = vst [vmem:[#allocation16_spill] sm:$0xff] %v4075_v27  ;;  %v3198_v29 = vrot.slane %v621_v61, 9  ;;  %3492 = vmatmul.mubr.msk.f32.vlgmr.msra.gmra.mrb[0].mxu0 %vm1849_vm8, %v4075_v27  ;;  %3438 = vmatprep.mubr.msk.f32.mxu1 %vm1849_vm8, %v4075_v27  ;;  %v3201_v34 = vrot.slane %v636_v17, 9  ;;  %v4086_v35 = vmax.f32 %v612_v3, %v3195_v32  ;;  %v1082_v45 = vmax.f32 %v620_v14, %v3196_v23 }
  0x45   : > { %v1083_v6 = vmax.f32 %v619_v9, %v3197_v25  ;;  %3504 = vmatpush3.msk.msra.mxu0 %vm1866_vm0, %v3875_v7  ;;  %v3202_v48 = vrot.slane %v638_v28, 9  ;;  %v1085_v60 = vmax.f32 %v629_v11, %v3199_v26  ;;  %v1086_v0 = vmax.f32 %v637_v19, %v3200_v30 }
  0x46   : > { %5026 = vst [vmem:[#allocation17_spill] sm:$0xff] %v4086_v35  ;;  %v1084_v57 = vmax.f32 %v621_v61, %v3198_v29  ;;  %v1087_v2 = vmax.f32 %v636_v17, %v3201_v34  ;;  %v4092_v8 = vrot.slane %v4086_v35, %v3895_v18  ;;  %v4095_v10 = vrot.slane %v1082_v45, %v3895_v18  ;;  %v491_v35 = vld [vmem:[%s3885_s25 + $0x90] sm:$0xff] }
  0x47   : > { %v4098_v3 = vrot.slane %v1083_v6, %v3895_v18  ;;  %3517 = vmatprep.subr.msk.mxu0 %vm1866_vm0, %v4080_v33  ;;  %v1088_v9 = vmax.f32 %v638_v28, %v3202_v48  ;;  %v4106_v11 = vrot.slane %v1085_v60, %v3895_v18  ;;  %v4109_v13 = vrot.slane %v1086_v0, %v3895_v18 }
  0x48   : > { %5027 = vst [vmem:[#allocation18_spill] sm:$0xff] %v4092_v8  ;;  %5028 = vst [vmem:[#allocation19_spill] sm:$0xff] %v4095_v10  ;;  %v4103_v7 = vrot.slane %v1084_v57, %v3895_v18  ;;  %v4112_v14 = vrot.slane %v1087_v2, %v3895_v18  ;;  %v1814_v32 = vsel %vm1698_vm1, %v4095_v10, %v4092_v8 }
  0x49   : > { %5029 = vst [vmem:[#allocation20_spill] sm:$0xff] %v4098_v3  ;;  %5030 = vst [vmem:[#allocation21_spill] sm:$0xff] %v4106_v11  ;;  %v646_v16 = vrot.slane %v511_v4, %v3891_v12  ;;  %v653_v61 = vrot.slane %v639_v15, %v3891_v12  ;;  %v4120_v17 = vrot.slane %v1088_v9, %v3895_v18 }
  0x4a   : > { %5031 = vst [vmem:[#allocation22_spill] sm:$0xff] %v4109_v13  ;;  %5032 = vst [vmem:[#allocation23_spill] sm:$0xff] %v4112_v14  ;;  %v1815_v19 = vsel %vm1561_vm2, %v4098_v3, %v1814_v32  ;;  %v656_v21 = vcombine.high %v512_v31, %v512_v31  ;;  %v663_v23 = vrot.slane %v512_v31, %v3891_v12 }
  0x4b   : > { %v1816_v25 = vsel %vm1563_vm3, %v4103_v7, %v1815_v19  ;;  %v654_v26 = vcombine.high %v646_v16, %v646_v16  ;;  %v655_v28 = vcombine.high %v653_v61, %v653_v61  ;;  %v3203_v29 = vrot.slane %v646_v16, 9 }
  0x4c   : > { %v1817_v4 = vsel %vm1565_vm4, %v4106_v11, %v1816_v25  ;;  %v670_v15 = vrot.slane %v656_v21, %v3891_v12  ;;  %v671_v30 = vcombine.high %v663_v23, %v663_v23  ;;  %v3205_v34 = vrot.slane %v653_v61, 9 }
  0x4d   : > { %v1818_v45 = vsel %vm1567_vm5, %v4109_v13, %v1817_v4  ;;  %v3204_v6 = vrot.slane %v654_v26, 9  ;;  %v3206_v48 = vrot.slane %v655_v28, 9  ;;  %v3207_v57 = vrot.slane %v663_v23, 9 }
  0x4e   : > { %v1819_v31 = vsel %vm1569_vm6, %v4112_v14, %v1818_v45  ;;  %v672_v60 = vcombine.high %v670_v15, %v670_v15  ;;  %v3208_v0 = vrot.slane %v671_v30, 9  ;;  %v3209_v2 = vrot.slane %v670_v15, 9 }
  0x4f   : > { %v4136_v9 = vsel %vm1571_vm7, %v4120_v17, %v1819_v31  ;;  %v4138_v32 = vmax.f32 %v646_v16, %v3203_v29  ;;  %v1090_v19 = vmax.f32 %v654_v26, %v3204_v6  ;;  %v1091_v21 = vmax.f32 %v653_v61, %v3205_v34  ;;  %v490_v29 = vld [vmem:[%s3885_s25 + $0x88] sm:$0xff]  ;;  %v492_v34 = vld [vmem:[%s3885_s25 + $0x98] sm:$0xff] }
  0x50   : > { %5033 = vst [vmem:[#allocation24_spill] sm:$0xff] %v4136_v9  ;;  %3494 = vmatprep.mubr.msk.f32.mxu0 %vm1849_vm8, %v4136_v9  ;;  %3439 = vmatmul.mubr.msk.f32.gmra.mrb[2].mxu1 %vm1849_vm8, %v4136_v9  ;;  %v3210_v25 = vrot.slane %v672_v60, 9  ;;  %v1092_v4 = vmax.f32 %v655_v28, %v3206_v48  ;;  %v1093_v45 = vmax.f32 %v663_v23, %v3207_v57 }
  0x51   : > { %5034 = vst [vmem:[#allocation25_spill] sm:$0xff] %v4138_v32  ;;  %v1094_v27 = vmax.f32 %v671_v30, %v3208_v0  ;;  %v1095_v31 = vmax.f32 %v670_v15, %v3209_v2  ;;  %v4148_v16 = vrot.slane %v4138_v32, %v3895_v18  ;;  %v4151_v26 = vrot.slane %v1090_v19, %v3895_v18 }
  0x52   : > { %v4154_v61 = vrot.slane %v1091_v21, %v3895_v18  ;;  %v1096_v6 = vmax.f32 %v672_v60, %v3210_v25  ;;  %v4159_v28 = vrot.slane %v1092_v4, %v3895_v18  ;;  %v4162_v23 = vrot.slane %v1093_v45, %v3895_v18 }
  0x53   : > { %5035 = vst [vmem:[#allocation26_spill] sm:$0xff] %v4148_v16  ;;  %5036 = vst [vmem:[#allocation27_spill] sm:$0xff] %v4151_v26  ;;  %v4165_v15 = vrot.slane %v1094_v27, %v3895_v18  ;;  %v4168_v30 = vrot.slane %v1095_v31, %v3895_v18  ;;  %v1821_v48 = vsel %vm1698_vm1, %v4151_v26, %v4148_v16 }
  0x54   : > { %5037 = vst [vmem:[#allocation28_spill] sm:$0xff] %v4154_v61  ;;  %v1705_v57 = vsel %vm1698_vm1, %v3968_v40, %v3965_v38  ;;  %v513_v60 = vmax.f32 %v489_v5, %v491_v35  ;;  %v4177_v0 = vrot.slane %v1096_v6, %v3895_v18  ;;  %v1822_v2 = vsel %vm1561_vm2, %v4154_v61, %v1821_v48 }
  0x55   : > { %v1706_v27 = vsel %vm1561_vm2, %v3971_v41, %v1705_v57  ;;  %v514_v19 = vmax.f32 %v490_v29, %v492_v34  ;;  %v1823_v21 = vsel %vm1563_vm3, %v4159_v28, %v1822_v2 }
  0x56   : > { %v1707_v25 = vsel %vm1563_vm3, %v3974_v42, %v1706_v27  ;;  %v673_v4 = vcombine.high %v513_v60, %v513_v60  ;;  %v680_v45 = vrot.slane %v513_v60, %v3891_v12  ;;  %v1824_v5 = vsel %vm1565_vm4, %v4162_v23, %v1823_v21 }
  0x57   : > { %v1708_v35 = vsel %vm1565_vm4, %v3979_v46, %v1707_v25  ;;  %v690_v31 = vcombine.high %v514_v19, %v514_v19  ;;  %v697_v6 = vrot.slane %v514_v19, %v3891_v12  ;;  %v1825_v29 = vsel %vm1567_vm5, %v4165_v15, %v1824_v5  ;;  %v493_v46 = vld [vmem:[%s3885_s25 + $0xa0] sm:$0xff] }
  0x58   : > { %v1709_v34 = vsel %vm1567_vm5, %v3982_v47, %v1708_v35  ;;  %v687_v48 = vrot.slane %v673_v4, %v3891_v12  ;;  %v688_v57 = vcombine.high %v680_v45, %v680_v45  ;;  %v1826_v60 = vsel %vm1569_vm6, %v4168_v30, %v1825_v29 }
  0x59   : > { %v1710_v2 = vsel %vm1569_vm6, %v3990_v50, %v1709_v34  ;;  %v704_v27 = vrot.slane %v690_v31, %v3891_v12  ;;  %v705_v21 = vcombine.high %v697_v6, %v697_v6  ;;  %v4205_v19 = vsel %vm1571_vm7, %v4177_v0, %v1826_v60 }
  0x5a   : > { %5038 = vst [vmem:[#allocation29_spill] sm:$0xff] %v4205_v19  ;;  %v4209_v25 = vsel %vm1779_vm9, %v1710_v2, %v3990_v50  ;;  %v689_v5 = vcombine.high %v687_v48, %v687_v48  ;;  %v3211_v4 = vrot.slane %v680_v45, 9  ;;  %3495 = vmatmul.mubr.msk.f32.gmra.mrb[2].mxu0 %vm1849_vm8, %v4205_v19  ;;  %3441 = vmatprep.mubr.msk.f32.mxu1 %vm1849_vm8, %v4205_v19  ;;  %v3212_v29 = vrot.slane %v688_v57, 9 }
  0x5b   : > { %5039 = vst [vmem:[#allocation30_spill] sm:$0xff] %v4209_v25  ;;  %v706_v35 = vcombine.high %v704_v27, %v704_v27  ;;  %v3213_v31 = vrot.slane %v687_v48, 9  ;;  %v3215_v34 = vrot.slane %v697_v6, 9  ;;  %3505 = vmatprep.mubr.msk.f32.mxu0 %vm1849_vm8, %v4209_v25  ;;  %v3216_v50 = vrot.slane %v705_v21, 9  ;;  %v495_v25 = vld [vmem:[%s3885_s25 + $0xb0] sm:$0xff] }
  0x5c   : > { %v3214_v60 = vrot.slane %v689_v5, 9  ;;  %v3217_v2 = vrot.slane %v704_v27, 9  ;;  %v4217_v9 = vmax.f32 %v680_v45, %v3211_v4  ;;  %v1098_v16 = vmax.f32 %v688_v57, %v3212_v29 }
  0x5d   : > { %v3218_v32 = vrot.slane %v706_v35, 9  ;;  %v1099_v22 = vmax.f32 %v687_v48, %v3213_v31  ;;  %v1101_v19 = vmax.f32 %v697_v6, %v3215_v34  ;;  %v1102_v8 = vmax.f32 %v705_v21, %v3216_v50  ;;  %v494_v6 = vld [vmem:[%s3885_s25 + $0xa8] sm:$0xff]  ;;  %v496_v48 = vld [vmem:[%s3885_s25 + $0xb8] sm:$0xff] }
  0x5e   : > { %5040 = vst [vmem:[#allocation31_spill] sm:$0xff] %v4217_v9  ;;  %v1100_v20 = vmax.f32 %v689_v5, %v3214_v60  ;;  %v1103_v24 = vmax.f32 %v704_v27, %v3217_v2  ;;  %v4221_v47 = vrot.slane %v4217_v9, %v3895_v18  ;;  %v4226_v36 = vrot.slane %v1098_v16, %v3895_v18 }
  0x5f   : > { %v1104_v42 = vmax.f32 %v706_v35, %v3218_v32  ;;  %v4229_v45 = vrot.slane %v1099_v22, %v3895_v18  ;;  %v4232_v57 = vrot.slane %v1101_v19, %v3895_v18  ;;  %v4240_v21 = vrot.slane %v1102_v8, %v3895_v18 }
  0x60   : > { %5041 = vst [vmem:[#allocation32_spill] sm:$0xff] %v4221_v47  ;;  %v4237_v27 = vrot.slane %v1100_v20, %v3895_v18  ;;  %v4243_v5 = vrot.slane %v1103_v24, %v3895_v18  ;;  %v1711_v32 = vsel %vm1698_vm1, %v4034_v43, %v4031_v39  ;;  %v1828_v16 = vsel %vm1698_vm1, %v4226_v36, %v4221_v47 }
  0x61   : > { %v4249_v22 = vrot.slane %v1104_v42, %v3895_v18  ;;  %v1712_v20 = vsel %vm1561_vm2, %v4042_v49, %v1711_v32  ;;  %v515_v19 = vmax.f32 %v493_v46, %v495_v25  ;;  %v1829_v8 = vsel %vm1561_vm2, %v4229_v45, %v1828_v16 }
  0x62   : > { %v1713_v24 = vsel %vm1563_vm3, %v4045_v51, %v1712_v20  ;;  %v516_v4 = vmax.f32 %v494_v6, %v496_v48  ;;  %v1717_v42 = vsel %vm1698_vm1, %v4098_v3, %v4095_v10  ;;  %v1830_v35 = vsel %vm1563_vm3, %v4237_v27, %v1829_v8 }
  0x63   : > { %v1714_v29 = vsel %vm1565_vm4, %v4048_v53, %v1713_v24  ;;  %v707_v31 = vcombine.high %v515_v19, %v515_v19  ;;  %v714_v46 = vrot.slane %v515_v19, %v3891_v12  ;;  %v1831_v25 = vsel %vm1565_vm4, %v4232_v57, %v1830_v35  ;;  %v4288_v24 = vld [vmem:[%s4968_s3 + $0x1c] sm:$0xf] }
  0x64   : > { %v1715_v34 = vsel %vm1567_vm5, %v4051_v54, %v1714_v29  ;;  %v724_v60 = vcombine.high %v516_v4, %v516_v4  ;;  %v731_v50 = vrot.slane %v516_v4, %v3891_v12  ;;  %v1832_v2 = vsel %vm1567_vm5, %v4240_v21, %v1831_v25  ;;  %5043 = vst [vmem:[#allocation34_spill] sm:$0xff] %v4288_v24 }
  0x65   : > { %v1716_v6 = vsel %vm1569_vm6, %v4054_v55, %v1715_v34  ;;  %v721_v48 = vrot.slane %v707_v31, %v3891_v12  ;;  %v722_v32 = vcombine.high %v714_v46, %v714_v46  ;;  %v1833_v16 = vsel %vm1569_vm6, %v4243_v5, %v1832_v2 }
  0x66   : > { %v4282_v20 = vsel %vm1779_vm9, %v1716_v6, %v4054_v55  ;;  %v738_v19 = vrot.slane %v724_v60, %v3891_v12  ;;  %v739_v8 = vcombine.high %v731_v50, %v731_v50  ;;  %v4292_v4 = vsel %vm1571_vm7, %v4249_v22, %v1833_v16 }
  0x67   : > { %5042 = vst [vmem:[#allocation33_spill] sm:$0xff] %v4282_v20  ;;  %5044 = vst [vmem:[#allocation35_spill] sm:$0xff] %v4292_v4  ;;  %3506 = vmatmul.mubr.msk.f32.vlgmr.msra.gmra.mrb[0].mxu0 %vm1849_vm8, %v4282_v20  ;;  %v723_v35 = vcombine.high %v721_v48, %v721_v48  ;;  %v3219_v29 = vrot.slane %v714_v46, 9  ;;  %v3220_v31 = vrot.slane %v722_v32, 9  ;;  %3442 = vmatmul.mubr.msk.f32.gmra.mrb[4].mxu1 %vm1849_vm8, %v4292_v4  ;;  %v3221_v25 = vrot.slane %v721_v48, 9 }
  0x68   : > { %3518 = vmatpush3.msk.msra.mxu0 %vm1866_vm0, %v4080_v33  ;;  %v740_v55 = vcombine.high %v738_v19, %v738_v19  ;;  %v3223_v34 = vrot.slane %v731_v50, 9  ;;  %v3224_v60 = vrot.slane %v739_v8, 9  ;;  %v3225_v6 = vrot.slane %v738_v19, 9 }
  0x69   : > { %v3222_v2 = vrot.slane %v723_v35, 9  ;;  %v4300_v16 = vmax.f32 %v714_v46, %v3219_v29  ;;  %v1106_v20 = vmax.f32 %v722_v32, %v3220_v31  ;;  %3531 = vmatprep.subr.msk.mxu0 %vm1866_vm0, %v4288_v24  ;;  %v1107_v9 = vmax.f32 %v721_v48, %v3221_v25  ;;  %v497_v46 = vld [vmem:[%s3885_s25 + $0xc0] sm:$0xff]  ;;  %v499_v32 = vld [vmem:[%s3885_s25 + $0xd0] sm:$0xff]  ;;  %v498_v48 = vld [vmem:[%s3885_s25 + $0xc8] sm:$0xff] }
  0x6a   : > { %v3226_v4 = vrot.slane %v740_v55, 9  ;;  %v1109_v47 = vmax.f32 %v731_v50, %v3223_v34  ;;  %v1110_v33 = vmax.f32 %v739_v8, %v3224_v60  ;;  %v1111_v10 = vmax.f32 %v738_v19, %v3225_v6  ;;  %v500_v19 = vld [vmem:[%s3885_s25 + $0xd8] sm:$0xff] }
  0x6b   : > { %5045 = vst [vmem:[#allocation36_spill] sm:$0xff] %v4300_v16  ;;  %v1108_v3 = vmax.f32 %v723_v35, %v3222_v2  ;;  %v4306_v54 = vrot.slane %v4300_v16, %v3895_v18  ;;  %v4309_v53 = vrot.slane %v1106_v20, %v3895_v18  ;;  %v4314_v31 = vrot.slane %v1107_v9, %v3895_v18 }
  0x6c   : > { %v1112_v29 = vmax.f32 %v740_v55, %v3226_v4  ;;  %v4317_v24 = vrot.slane %v1109_v47, %v3895_v18  ;;  %v4320_v50 = vrot.slane %v1110_v33, %v3895_v18  ;;  %v4328_v20 = vrot.slane %v1111_v10, %v3895_v18 }
  0x6d   : > { %5046 = vst [vmem:[#allocation37_spill] sm:$0xff] %v4306_v54  ;;  %v4325_v8 = vrot.slane %v1108_v3, %v3895_v18  ;;  %v1835_v4 = vsel %vm1698_vm1, %v4309_v53, %v4306_v54  ;;  %v1718_v9 = vsel %vm1561_vm2, %v4103_v7, %v1717_v42  ;;  %v517_v55 = vmax.f32 %v497_v46, %v499_v32 }
  0x6e   : > { %v4336_v47 = vrot.slane %v1112_v29, %v3895_v18  ;;  %v1836_v35 = vsel %vm1561_vm2, %v4314_v31, %v1835_v4  ;;  %v1719_v3 = vsel %vm1563_vm3, %v4106_v11, %v1718_v9  ;;  %v518_v34 = vmax.f32 %v498_v48, %v500_v19 }
  0x6f   : > { %v1837_v10 = vsel %vm1563_vm3, %v4325_v8, %v1836_v35  ;;  %v1720_v25 = vsel %vm1565_vm4, %v4109_v13, %v1719_v3  ;;  %v1723_v42 = vsel %vm1698_vm1, %v4154_v61, %v4151_v26  ;;  %v741_v6 = vcombine.high %v517_v55, %v517_v55 }
  0x70   : > { %v1838_v60 = vsel %vm1565_vm4, %v4317_v24, %v1837_v10  ;;  %v1721_v2 = vsel %vm1567_vm5, %v4112_v14, %v1720_v25  ;;  %v748_v33 = vrot.slane %v517_v55, %v3891_v12  ;;  %v758_v29 = vcombine.high %v518_v34, %v518_v34 }
  0x71   : > { %v1839_v46 = vsel %vm1567_vm5, %v4320_v50, %v1838_v60  ;;  %v1722_v32 = vsel %vm1569_vm6, %v4120_v17, %v1721_v2  ;;  %v765_v48 = vrot.slane %v518_v34, %v3891_v12  ;;  %v755_v9 = vrot.slane %v741_v6, %v3891_v12 }
  0x72   : > { %v1840_v19 = vsel %vm1569_vm6, %v4328_v20, %v1839_v46  ;;  %v4363_v4 = vsel %vm1779_vm9, %v1722_v32, %v4120_v17  ;;  %v756_v35 = vcombine.high %v748_v33, %v748_v33  ;;  %v772_v55 = vrot.slane %v758_v29, %v3891_v12 }
  0x73   : > { %5047 = vst [vmem:[#allocation38_spill] sm:$0xff] %v4363_v4  ;;  %v4368_v3 = vsel %vm1571_vm7, %v4336_v47, %v1840_v19  ;;  %3508 = vmatprep.mubr.msk.f32.mxu0 %vm1849_vm8, %v4363_v4  ;;  %v773_v10 = vcombine.high %v765_v48, %v765_v48  ;;  %v3227_v25 = vrot.slane %v748_v33, 9  ;;  %v757_v34 = vcombine.high %v755_v9, %v755_v9 }
  0x74   : > { %5048 = vst [vmem:[#allocation39_spill] sm:$0xff] %v4368_v3  ;;  %3444 = vmatprep.mubr.msk.f32.mxu1 %vm1849_vm8, %v4368_v3  ;;  %v3228_v17 = vrot.slane %v756_v35, 9  ;;  %v3229_v60 = vrot.slane %v755_v9, 9  ;;  %v3231_v2 = vrot.slane %v765_v48, 9  ;;  %v774_v6 = vcombine.high %v772_v55, %v772_v55 }
  0x75   : > { %v3232_v46 = vrot.slane %v773_v10, 9  ;;  %v3233_v32 = vrot.slane %v772_v55, 9  ;;  %v4375_v16 = vmax.f32 %v748_v33, %v3227_v25  ;;  %v3230_v19 = vrot.slane %v757_v34, 9 }
  0x76   : > { %v1114_v54 = vmax.f32 %v756_v35, %v3228_v17  ;;  %v1115_v4 = vmax.f32 %v755_v9, %v3229_v60  ;;  %v1117_v14 = vmax.f32 %v765_v48, %v3231_v2  ;;  %v3234_v29 = vrot.slane %v774_v6, 9 }
  0x77   : > { %v1118_v61 = vmax.f32 %v773_v10, %v3232_v46  ;;  %v1119_v12 = vmax.f32 %v772_v55, %v3233_v32  ;;  %v4379_v3 = vrot.slane %v4375_v16, %v3895_v18  ;;  %v1116_v13 = vmax.f32 %v757_v34, %v3230_v19 }
  0x78   : > { %v4382_v26 = vrot.slane %v1114_v54, %v3895_v18  ;;  %v4385_v11 = vrot.slane %v1115_v4, %v3895_v18  ;;  %v4388_v33 = vrot.slane %v1117_v14, %v3895_v18  ;;  %v1120_v35 = vmax.f32 %v774_v6, %v3234_v29 }
  0x79   : > { %v4391_v48 = vrot.slane %v1118_v61, %v3895_v18  ;;  %v4394_v9 = vrot.slane %v1119_v12, %v3895_v18  ;;  %v1724_v55 = vsel %vm1561_vm2, %v4159_v28, %v1723_v42  ;;  %v4399_v10 = vrot.slane %v1116_v13, %v3895_v18 }
  0x7a   : > { %v1842_v54 = vsel %vm1698_vm1, %v4382_v26, %v4379_v3  ;;  %v1725_v14 = vsel %vm1563_vm3, %v4162_v23, %v1724_v55  ;;  %v1562_v61 = vsel %vm1561_vm2, %v3922_v58, %v3916_v52  ;;  %v4410_v12 = vrot.slane %v1120_v35, %v3895_v18 }
  0x7b   : > { %v1843_v42 = vsel %vm1561_vm2, %v4385_v11, %v1842_v54  ;;  %v1726_v13 = vsel %vm1565_vm4, %v4165_v15, %v1725_v14  ;;  %v1564_v4 = vsel %vm1563_vm3, %v3925_v59, %v1562_v61  ;;  %v1729_v17 = vsel %vm1698_vm1, %v4229_v45, %v4226_v36 }
  0x7c   : > { %v1844_v25 = vsel %vm1563_vm3, %v4399_v10, %v1843_v42  ;;  %v1727_v34 = vsel %vm1567_vm5, %v4168_v30, %v1726_v13  ;;  %v1566_v52 = vsel %vm1565_vm4, %v3935_v1, %v1564_v4  ;;  %v1730_v46 = vsel %vm1561_vm2, %v4237_v27, %v1729_v17 }
  0x7d   : > { %v1845_v60 = vsel %vm1565_vm4, %v4388_v33, %v1844_v25  ;;  %v1728_v2 = vsel %vm1569_vm6, %v4177_v0, %v1727_v34  ;;  %v1568_v6 = vsel %vm1567_vm5, %v3919_v56, %v1566_v52  ;;  %v1731_v35 = vsel %vm1563_vm3, %v4232_v57, %v1730_v46  ;;  %v5050_v52 = vld [vmem:[#allocation8_spill] sm:$0xff] }
  0x7e   : > { %v1846_v32 = vsel %vm1567_vm5, %v4391_v48, %v1845_v60  ;;  %v4439_v19 = vsel %vm1779_vm9, %v1728_v2, %v4177_v0  ;;  %v1570_v29 = vsel %vm1569_vm6, %v3929_v62, %v1568_v6  ;;  %v1732_v14 = vsel %vm1565_vm4, %v4240_v21, %v1731_v35 }
  0x7f   : > { %v1847_v55 = vsel %vm1569_vm6, %v4394_v9, %v1846_v32  ;;  %3509 = vmatmul.mubr.msk.f32.gmra.mrb[2].mxu0 %vm1849_vm8, %v4439_v19  ;;  %v1572_v54 = vsel %vm1571_vm7, %v3932_v63, %v1570_v29  ;;  %v1573_v0 = vsel %vm1561_vm2, %v3965_v38, %v3962_v37  ;;  %v1733_v13 = vsel %vm1567_vm5, %v4243_v5, %v1732_v14  ;;  %v5052_v32 = vld [vmem:[#allocation10_spill] sm:$0xff] }
  0x80   : > { %v4458_v61 = vsel %vm1571_vm7, %v4410_v12, %v1847_v55  ;;  %v1638_v42 = vsel %vm1637_vm10, %v3912_v44, %v1572_v54  ;;  %v1574_v4 = vsel %vm1563_vm3, %v3968_v40, %v1573_v0  ;;  %v1734_v25 = vsel %vm1569_vm6, %v4249_v22, %v1733_v13  ;;  %v5049_v44 = vld [vmem:[#allocation13_spill] sm:$0xff]  ;;  %v5053_v54 = vld [vmem:[#allocation7_spill] sm:$0xff]  ;;  %v5054_v0 = vld [vmem:[#allocation14_spill] sm:$0xff] }
  0x81   : > { %3445 = vmatmul.mubr.msk.f32.gmra.mrb[6].mxu1 %vm1849_vm8, %v4458_v61  ;;  %v1575_v37 = vsel %vm1565_vm4, %v3971_v41, %v1574_v4  ;;  %v1735_v38 = vsel %vm1698_vm1, %v4314_v31, %v4309_v53  ;;  %v1579_v34 = vsel %vm1561_vm2, %v4031_v39, %v5049_v44  ;;  %v4481_v40 = vsel %vm1779_vm9, %v1734_v25, %v4249_v22  ;;  %v5051_v39 = vld [vmem:[#allocation9_spill] sm:$0xff]  ;;  %v503_v25 = vld [vmem:[%s3885_s25 + $0xf0] sm:$0xff] }
  0x82   : > { %3449 = vmatprep.mubr.msk.f32.mxu1 %vm1849_vm8, %v1638_v42  ;;  %v1576_v17 = vsel %vm1567_vm5, %v5050_v52, %v1575_v37  ;;  %v1736_v41 = vsel %vm1561_vm2, %v4325_v8, %v1735_v38  ;;  %v1580_v60 = vsel %vm1563_vm3, %v4034_v43, %v1579_v34  ;;  %3511 = vmatprep.mubr.msk.f32.mxu0 %vm1849_vm8, %v4481_v40  ;;  %v501_v4 = vld [vmem:[%s3885_s25 + $0xe0] sm:$0xff]  ;;  %v5055_v37 = vld [vmem:[#allocation15_spill] sm:$0xff]  ;;  %v5056_v34 = vld [vmem:[#allocation18_spill] sm:$0xff] }
  0x83   : > { %v1577_v2 = vsel %vm1569_vm6, %v5051_v39, %v1576_v17  ;;  %v1737_v22 = vsel %vm1563_vm3, %v4317_v24, %v1736_v41  ;;  %v1581_v6 = vsel %vm1565_vm4, %v4042_v49, %v1580_v60  ;;  %v1741_v46 = vsel %vm1698_vm1, %v4385_v11, %v4382_v26  ;;  %v5057_v52 = vld [vmem:[#allocation19_spill] sm:$0xff]  ;;  %v502_v41 = vld [vmem:[%s3885_s25 + $0xe8] sm:$0xff]  ;;  %v504_v60 = vld [vmem:[%s3885_s25 + $0xf8] sm:$0xff]  ;;  %s384_s25 = scalar_lea.vmem %s4967_s2, %s3349_s17 }
  0x84   : > { %v1578_v43 = vsel %vm1571_vm7, %v5052_v32, %v1577_v2  ;;  %v1738_v29 = vsel %vm1565_vm4, %v4320_v50, %v1737_v22  ;;  %v1582_v35 = vsel %vm1567_vm5, %v4045_v51, %v1581_v6  ;;  %v1742_v55 = vsel %vm1561_vm2, %v4399_v10, %v1741_v46  ;;  %v4536_v39 = vld [vmem:[%s4968_s3 + $0xc] sm:$0xf]  ;;  %v5058_v2 = vld [vmem:[#allocation11_spill] sm:$0xff]  ;;  %v5059_v6 = vld [vmem:[#allocation12_spill] sm:$0xff] }
  0x85   : > { %v4510_v49 = vsel %vm1637_vm10, %v5053_v54, %v1578_v43  ;;  %v1739_v14 = vsel %vm1567_vm5, %v4328_v20, %v1738_v29  ;;  %v1583_v42 = vsel %vm1569_vm6, %v5054_v0, %v1582_v35  ;;  %v1743_v13 = vsel %vm1563_vm3, %v4388_v33, %v1742_v55  ;;  %v5060_v43 = vld [vmem:[#allocation20_spill] sm:$0xff] }
  0x86   : > { %3450 = vmatmul.mubr.msk.f32.vlgmr.msra.gmra.mrb[0].mxu1 %vm1849_vm8, %v4510_v49  ;;  %v1740_v51 = vsel %vm1569_vm6, %v4336_v47, %v1739_v14  ;;  %v1584_v38 = vsel %vm1571_vm7, %v5055_v37, %v1583_v42  ;;  %v1744_v44 = vsel %vm1565_vm4, %v4391_v48, %v1743_v13  ;;  %v1585_v17 = vsel %vm1561_vm2, %v5057_v52, %v5056_v34  ;;  %v5061_v14 = vld [vmem:[#allocation21_spill] sm:$0xff]  ;;  %v5062_v13 = vld [vmem:[#allocation26_spill] sm:$0xff]  ;;  %v5067_v52 = vld [vmem:[#allocation23_spill] sm:$0xff] }
  0x87   : > { %3462 = vmatpush3.msk.msra.mxu1 %vm1866_vm0, %v5058_v2  ;;  %v4542_v22 = vsel %vm1779_vm9, %v1740_v51, %v4336_v47  ;;  %v4546_v46 = vsel %vm1637_vm10, %v5059_v6, %v1584_v38  ;;  %v1745_v32 = vsel %vm1567_vm5, %v4394_v9, %v1744_v44  ;;  %v1586_v29 = vsel %vm1563_vm3, %v5060_v43, %v1585_v17  ;;  %v5063_v51 = vld [vmem:[#allocation27_spill] sm:$0xff]  ;;  %v5066_v44 = vld [vmem:[#allocation28_spill] sm:$0xff]  ;;  %v5068_v6 = vld [vmem:[#allocation17_spill] sm:$0xff] }
  0x88   : > { %3512 = vmatmul.mubr.msk.f32.gmra.mrb[4].mxu0 %vm1849_vm8, %v4542_v22  ;;  %3452 = vmatprep.mubr.msk.f32.mxu1 %vm1849_vm8, %v4546_v46  ;;  %v1746_v47 = vsel %vm1569_vm6, %v4410_v12, %v1745_v32  ;;  %v1587_v35 = vsel %vm1565_vm4, %v4103_v7, %v1586_v29  ;;  %v519_v55 = vmax.f32 %v501_v4, %v503_v25  ;;  %v5064_v7 = vld [vmem:[#allocation22_spill] sm:$0xff] }
  0x89   : > { %v4562_v54 = vsel %vm1779_vm9, %v1746_v47, %v4410_v12  ;;  %v1588_v0 = vsel %vm1567_vm5, %v5061_v14, %v1587_v35  ;;  %v520_v42 = vmax.f32 %v502_v41, %v504_v60  ;;  %v1591_v37 = vsel %vm1561_vm2, %v5063_v51, %v5062_v13  ;;  %3475 = vmatprep.subr.msk.mxu1 %vm1866_vm0, %v4536_v39  ;;  %v5065_v12 = vld [vmem:[#allocation5_spill] sm:$0xff] }
  0x8a   : > { %3514 = vmatprep.mubr.msk.f32.mxu0 %vm1849_vm8, %v4562_v54  ;;  %v1589_v4 = vsel %vm1569_vm6, %v5064_v7, %v1588_v0  ;;  %v775_v25 = vcombine.high %v519_v55, %v519_v55  ;;  %v4576_v38 = vrot.slane %v519_v55, %v5065_v12  ;;  %v1592_v34 = vsel %vm1563_vm3, %v5066_v44, %v1591_v37 }
  0x8b   : > { %v1590_v17 = vsel %vm1571_vm7, %v5067_v52, %v1589_v4  ;;  %v792_v41 = vcombine.high %v520_v42, %v520_v42  ;;  %v799_v60 = vrot.slane %v520_v42, %v5065_v12  ;;  %v1593_v2 = vsel %vm1565_vm4, %v4159_v28, %v1592_v34  ;;  %v5069_v52 = vld [vmem:[#allocation25_spill] sm:$0xff] }
  0x8c   : > { %v4587_v32 = vsel %vm1637_vm10, %v5068_v6, %v1590_v17  ;;  %v789_v43 = vrot.slane %v775_v25, %v5065_v12  ;;  %v790_v29 = vcombine.high %v4576_v38, %v4576_v38  ;;  %v1594_v47 = vsel %vm1567_vm5, %v4162_v23, %v1593_v2 }
  0x8d   : > { %3453 = vmatmul.mubr.msk.f32.gmra.mrb[2].mxu1 %vm1849_vm8, %v4587_v32  ;;  %v806_v35 = vrot.slane %v792_v41, %v5065_v12  ;;  %v807_v55 = vcombine.high %v799_v60, %v799_v60  ;;  %v3239_v14 = vrot.slane %v799_v60, 9  ;;  %v1595_v28 = vsel %vm1569_vm6, %v4165_v15, %v1594_v47 }
  0x8e   : > { %v791_v0 = vcombine.high %v789_v43, %v789_v43  ;;  %v3236_v42 = vrot.slane %v790_v29, 9  ;;  %v3237_v13 = vrot.slane %v789_v43, 9  ;;  %v1596_v51 = vsel %vm1571_vm7, %v4168_v30, %v1595_v28 }
  0x8f   : > { %v808_v37 = vcombine.high %v806_v35, %v806_v35  ;;  %v3240_v7 = vrot.slane %v807_v55, 9  ;;  %v3241_v23 = vrot.slane %v806_v35, 9  ;;  %v1125_v4 = vmax.f32 %v799_v60, %v3239_v14 }
  0x90   : > { %v3238_v25 = vrot.slane %v791_v0, 9  ;;  %v1122_v44 = vmax.f32 %v790_v29, %v3236_v42  ;;  %v1123_v34 = vmax.f32 %v789_v43, %v3237_v13  ;;  %v4603_v17 = vsel %vm1637_vm10, %v5069_v52, %v1596_v51  ;;  %v5070_v43 = vld [vmem:[#allocation32_spill] sm:$0xff]  ;;  %v5071_v13 = vld [vmem:[#allocation37_spill] sm:$0xff] }
  0x91   : > { %v3242_v41 = vrot.slane %v808_v37, 9  ;;  %v1126_v15 = vmax.f32 %v807_v55, %v3240_v7  ;;  %v1127_v2 = vmax.f32 %v806_v35, %v3241_v23  ;;  %v4606_v6 = vrot.slane %v1125_v4, %v3895_v18  ;;  %3455 = vmatprep.mubr.msk.f32.mxu1 %vm1849_vm8, %v4603_v17 }
  0x92   : > { %v1124_v30 = vmax.f32 %v791_v0, %v3238_v25  ;;  %v4611_v47 = vrot.slane %v1122_v44, %v3895_v18  ;;  %v4614_v60 = vrot.slane %v1123_v34, %v3895_v18  ;;  %v1597_v29 = vsel %vm1561_vm2, %v4226_v36, %v5070_v43  ;;  %v5072_v44 = vld [vmem:[#allocation31_spill] sm:$0xff] }
  0x93   : > { %v1128_v55 = vmax.f32 %v808_v37, %v3242_v41  ;;  %v4621_v35 = vrot.slane %v1126_v15, %v3895_v18  ;;  %v4624_v14 = vrot.slane %v1127_v2, %v3895_v18  ;;  %v1598_v28 = vsel %vm1563_vm3, %v4229_v45, %v1597_v29  ;;  %v1130_v41 = vld [vmem:[%s384_s25 + $0x8] sm:$0xff]  ;;  %v1131_v15 = vld [vmem:[%s384_s25 + $0x10] sm:$0xff] }
  0x94   : > { %v4629_v0 = vrot.slane %v1124_v30, %v3895_v18  ;;  %v1747_v42 = vsel %vm1698_vm1, %v4614_v60, %v4611_v47  ;;  %v1599_v36 = vsel %vm1565_vm4, %v4237_v27, %v1598_v28  ;;  %v1603_v51 = vsel %vm1561_vm2, %v4309_v53, %v5071_v13  ;;  %v5073_v30 = vld [vmem:[#allocation36_spill] sm:$0xff] }
  0x95   : > { %v4640_v37 = vrot.slane %v1128_v55, %v3895_v18  ;;  %v1600_v45 = vsel %vm1567_vm5, %v4232_v57, %v1599_v36  ;;  %v1604_v7 = vsel %vm1563_vm3, %v4314_v31, %v1603_v51  ;;  %v1609_v23 = vsel %vm1561_vm2, %v4382_v26, %v4379_v3 }
  0x96   : > { %v1748_v53 = vsel %vm1561_vm2, %v4629_v0, %v1747_v42  ;;  %v1601_v27 = vsel %vm1569_vm6, %v4240_v21, %v1600_v45  ;;  %v1605_v57 = vsel %vm1565_vm4, %v4325_v8, %v1604_v7  ;;  %v1610_v31 = vsel %vm1563_vm3, %v4385_v11, %v1609_v23  ;;  %v5074_v42 = vld [vmem:[#allocation6_spill] sm:$0xff] }
  0x97   : > { %v1749_v4 = vsel %vm1563_vm3, %v4606_v6, %v1748_v53  ;;  %v1602_v26 = vsel %vm1571_vm7, %v4243_v5, %v1601_v27  ;;  %v1606_v3 = vsel %vm1567_vm5, %v4317_v24, %v1605_v57  ;;  %v1611_v25 = vsel %vm1565_vm4, %v4399_v10, %v1610_v31  ;;  %v1129_v5 = vld [vmem:[%s384_s25] sm:$0xff]  ;;  %v5075_v31 = vld [vmem:[#allocation34_spill] sm:$0xff] }
  0x98   : > { %v1750_v21 = vsel %vm1565_vm4, %v4621_v35, %v1749_v4  ;;  %v4672_v8 = vsel %vm1637_vm10, %v5072_v44, %v1602_v26  ;;  %v1607_v11 = vsel %vm1569_vm6, %v4320_v50, %v1606_v3  ;;  %v1612_v34 = vsel %vm1567_vm5, %v4388_v33, %v1611_v25  ;;  %v1132_v33 = vld [vmem:[%s384_s25 + $0x18] sm:$0xff]  ;;  %v5076_v25 = vld [vmem:[#allocation30_spill] sm:$0xff]  ;;  %s3684_s25 = scalar_lea.vmem %s4911_s15, 1024 }
  0x99   : > { %v1751_v24 = vsel %vm1567_vm5, %v4624_v14, %v1750_v21  ;;  %3456 = vmatmul.mubr.msk.f32.gmra.mrb[4].mxu1 %vm1849_vm8, %v4672_v8  ;;  %v1608_v10 = vsel %vm1571_vm7, %v4328_v20, %v1607_v11  ;;  %v1613_v52 = vsel %vm1569_vm6, %v4391_v48, %v1612_v34  ;;  %v1699_v50 = vsel %vm1698_vm1, %v3925_v59, %v3922_v58  ;;  %v5077_v34 = vld [vmem:[#allocation33_spill] sm:$0xff]  ;;  %p3685_p12 = scmp.ne.s32.totalorder %s4911_s15, %s3684_s25  ;;  %p3692_p2 = scmp.lt.s32.totalorder %s3690_s7, %s3684_s25 }
  0x9a   : > { %v1752_v2 = vsel %vm1569_vm6, %v4640_v37, %v1751_v24  ;;  %v4693_v43 = vsel %vm1637_vm10, %v5073_v30, %v1608_v10  ;;  %v1614_v20 = vsel %vm1571_vm7, %v4394_v9, %v1613_v52  ;;  %v1700_v48 = vsel %vm1561_vm2, %v3935_v1, %v1699_v50 }
  0x9b   : > { %v4701_v29 = vsel %vm1779_vm9, %v1752_v2, %v4640_v37  ;;  %3458 = vmatprep.mubr.msk.f32.mxu1 %vm1849_vm8, %v4693_v43  ;;  %v4707_v58 = vsel %vm1637_vm10, %v4375_v16, %v1614_v20  ;;  %v1701_v59 = vsel %vm1563_vm3, %v3919_v56, %v1700_v48  ;;  %v3235_v55 = vrot.slane %v4576_v38, 9  ;;  %p3686_p13 = pnand %p3685_p12, %p3838_p4  ;;  %p3693_p3 = por %p3692_p2, %p3691_p1 }
  0x9c   : > { %3515 = vmatmul.mubr.msk.f32.gmra.mrb[6].mxu0 %vm1849_vm8, %v4701_v29  ;;  %v1702_v1 = vsel %vm1565_vm4, %v3929_v62, %v1701_v59  ;;  %v1133_v9 = vmax.f32 %v1129_v5, %v1131_v15  ;;  %v1134_v28 = vmax.f32 %v1130_v41, %v1132_v33 }
  0x9d   : > { %3519 = vmatprep.mubr.msk.f32.mxu0 %vm1849_vm8, %v4546_v46  ;;  %3459 = vmatmul.mubr.msk.f32.gmra.mrb[6].mxu1 %vm1849_vm8, %v4707_v58  ;;  %v1703_v16 = vsel %vm1567_vm5, %v3932_v63, %v1702_v1  ;;  %v1121_v56 = vmax.f32 %v4576_v38, %v3235_v55  ;;  %v4733_v63 = vld [vmem:[%s4968_s3 + $0x20] sm:$0xf]  ;;  %v5078_v55 = vld [vmem:[#allocation38_spill] sm:$0xff]  ;;  %p3687_p0 = pneg %p3686_p13 }
  0x9e   : > { %v1704_v36 = vsel %vm1569_vm6, %v5074_v42, %v1703_v16  ;;  %v1137_v13 = vcombine.high %v1133_v9, %v1133_v9  ;;  %v1144_v51 = vrot.slane %v1133_v9, %v5065_v12  ;;  %v1154_v62 = vcombine.high %v1134_v28, %v1134_v28 }
  0x9f   : > { %v1780_v45 = vsel %vm1779_vm9, %v1704_v36, %v5074_v42  ;;  %v1508_v7 = vrot.slane %v1121_v56, %v3895_v18  ;;  %v1161_v23 = vrot.slane %v1134_v28, %v5065_v12  ;;  %p3694_p5 = pnand %p3693_p3, %p3687_p0 }
  0xa0   : > { %3520 = vmatmul.mubr.msk.f32.vlgmr.msra.gmra.mrb[0].mxu0 %vm1849_vm8, %v4587_v32  ;;  %3463 = vmatprep.mubr.msk.f32.mxu1 %vm1849_vm8, %v1780_v45  ;;  %v1151_v38 = vrot.slane %v1137_v13, %v5065_v12  ;;  %v1152_v53 = vcombine.high %v1144_v51, %v1144_v51  ;;  %v1168_v27 = vrot.slane %v1154_v62, %v5065_v12  ;;  %v3243_v57 = vrot.slane %v1144_v51, 9 }
  0xa1   : > { %3532 = vmatpush3.msk.msra.mxu0 %vm1866_vm0, %v5075_v31  ;;  %3522 = vmatprep.mubr.msk.f32.mxu0 %vm1849_vm8, %v4603_v17  ;;  %v1615_v4 = vsel %vm1561_vm2, %v4611_v47, %v1508_v7  ;;  %v1169_v26 = vcombine.high %v1161_v23, %v1161_v23  ;;  %v3247_v3 = vrot.slane %v1161_v23, 9  ;;  %v2372_v42 = vsel %vm1698_vm1, %v4611_v47, %v1508_v7 }
  0xa2   : > { %3464 = vmatmul.mubr.msk.f32.vlgmr.msra.gmra.mrb[0].mxu1 %vm1849_vm8, %v5076_v25  ;;  %v1616_v21 = vsel %vm1563_vm3, %v4614_v60, %v1615_v4  ;;  %v1153_v44 = vcombine.high %v1151_v38, %v1151_v38  ;;  %v3244_v12 = vrot.slane %v1152_v53, 9  ;;  %v3245_v11 = vrot.slane %v1151_v38, 9  ;;  %3545 = vmatprep.subr.msk.mxu0 %vm1866_vm0, %v4733_v63 }
  0xa3   : > { %3476 = vmatpush3.msk.msra.mxu1 %vm1866_vm0, %v4536_v39  ;;  %3466 = vmatprep.mubr.msk.f32.mxu1 %vm1849_vm8, %v5077_v34  ;;  %v1617_v5 = vsel %vm1565_vm4, %v4629_v0, %v1616_v21  ;;  %v3248_v24 = vrot.slane %v1169_v26, 9  ;;  %v3249_v10 = vrot.slane %v1168_v27, 9  ;;  %v1203_v52 = vmax.f32 %v1144_v51, %v3243_v57  ;;  %v3683_v39 = vld [vmem:[%s4968_s3 + $0x10] sm:$0xf] }
  0xa4   : > { %3523 = vmatmul.mubr.msk.f32.gmra.mrb[2].mxu0 %vm1849_vm8, %v4672_v8  ;;  %v1618_v50 = vsel %vm1567_vm5, %v4606_v6, %v1617_v5  ;;  %v3246_v41 = vrot.slane %v1153_v44, 9  ;;  %v1204_v15 = vmax.f32 %v1152_v53, %v3244_v12  ;;  %v1205_v33 = vmax.f32 %v1151_v38, %v3245_v11  ;;  %3559 = vmatprep.subr.msk.mxu1 %vm1866_vm0, %v3683_v39  ;;  %v5082_v5 = vld [vmem:[#allocation35_spill] sm:$0xff] }
  0xa5   : > { %3525 = vmatprep.mubr.msk.f32.mxu0 %vm1849_vm8, %v4693_v43  ;;  %v1619_v2 = vsel %vm1569_vm6, %v4621_v35, %v1618_v50  ;;  %v1207_v30 = vmax.f32 %v1161_v23, %v3247_v3  ;;  %v1208_v20 = vmax.f32 %v1169_v26, %v3248_v24  ;;  %v1209_v48 = vmax.f32 %v1168_v27, %v3249_v10 }
  0xa6   : > { %v1620_v59 = vsel %vm1571_vm7, %v4624_v14, %v1619_v2  ;;  %3467 = vmatmul.mubr.msk.f32.gmra.mrb[2].mxu1 %vm1849_vm8, %v5078_v55  ;;  %v1206_v1 = vmax.f32 %v1153_v44, %v3246_v41  ;;  %v1536_v9 = vrot.slane %v1203_v52, %v3895_v18  ;;  %v1540_v28 = vrot.slane %v1204_v15, %v3895_v18  ;;  %v5080_v44 = vld [vmem:[#allocation24_spill] sm:$0xff] }
  0xa7   : > { %v1646_v16 = vsel %vm1637_vm10, %v1121_v56, %v1620_v59  ;;  %v1544_v36 = vrot.slane %v1205_v33, %v3895_v18  ;;  %v1552_v13 = vrot.slane %v1207_v30, %v3895_v18  ;;  %3469 = vmatprep.mubr.msk.f32.mxu1 %vm1849_vm8, %v4439_v19  ;;  %v1556_v62 = vrot.slane %v1208_v20, %v3895_v18 }
  0xa8   : > { %3526 = vmatmul.mubr.msk.f32.gmra.mrb[4].mxu0 %vm1849_vm8, %v4707_v58  ;;  %v1548_v51 = vrot.slane %v1206_v1, %v3895_v18  ;;  %v1621_v45 = vsel %vm1561_vm2, %v1540_v28, %v1536_v9  ;;  %v1560_v47 = vrot.slane %v1209_v48, %v3895_v18  ;;  %v2741_v23 = vsel %vm1698_vm1, %v1540_v28, %v1536_v9 }
  0xa9   : > { %3528 = vmatprep.mubr.msk.f32.mxu0 %vm1849_vm8, %v1646_v16  ;;  %v1622_v56 = vsel %vm1563_vm3, %v1544_v36, %v1621_v45  ;;  %v2373_v38 = vsel %vm1561_vm2, %v4614_v60, %v2372_v42  ;;  %v1170_v31 = vcombine.high %v1168_v27, %v1168_v27  ;;  %v2742_v3 = vsel %vm1561_vm2, %v1544_v36, %v2741_v23  ;;  %v5079_v60 = vld [vmem:[#allocation16_spill] sm:$0xff] }
  0xaa   : > { %v1623_v7 = vsel %vm1565_vm4, %v1548_v51, %v1622_v56  ;;  %3470 = vmatmul.mubr.msk.f32.gmra.mrb[4].mxu1 %vm1849_vm8, %v4481_v40  ;;  %v2374_v26 = vsel %vm1563_vm3, %v4629_v0, %v2373_v38  ;;  %v2743_v0 = vsel %vm1563_vm3, %v1548_v51, %v2742_v3 }
  0xab   : > { %v1624_v53 = vsel %vm1567_vm5, %v1552_v13, %v1623_v7  ;;  %3472 = vmatprep.mubr.msk.f32.mxu1 %vm1849_vm8, %v4542_v22  ;;  %v2375_v27 = vsel %vm1565_vm4, %v4606_v6, %v2374_v26  ;;  %v3250_v21 = vrot.slane %v1170_v31, 9  ;;  %v2744_v12 = vsel %vm1565_vm4, %v1552_v13, %v2743_v0  ;;  %v5081_v6 = vld [vmem:[#allocation29_spill] sm:$0xff] }
  0xac   : > { %v1625_v57 = vsel %vm1569_vm6, %v1556_v62, %v1624_v53 }
  0xad   : > { %v1626_v4 = vsel %vm1571_vm7, %v1560_v47, %v1625_v57  ;;  %v1210_v11 = vmax.f32 %v1170_v31, %v3250_v21 }
  0xae   : > { %v1647_v25 = vsel %vm1637_vm10, %v1203_v52, %v1626_v4  ;;  %3473 = vmatmul.mubr.msk.f32.gmra.mrb[6].mxu1 %vm1849_vm8, %v4562_v54 }
  0xaf   : > { %3529 = vmatmul.mubr.msk.f32.gmra.mrb[6].mxu0 %vm1849_vm8, %v1647_v25  ;;  %3477 = vmatprep.mubr.msk.f32.mxu1 %vm1849_vm8, %v4510_v49  ;;  %v2376_v49 = vsel %vm1567_vm5, %v4621_v35, %v2375_v27  ;;  %v2745_v35 = vsel %vm1567_vm5, %v1556_v62, %v2744_v12  ;;  %v1697_v24 = vrot.slane %v1210_v11, %v3895_v18 }
  0xb0   : > { %3533 = vmatprep.mubr.msk.f32.mxu0 %vm1849_vm8, %v5079_v60 }
  0xb2   : > { %3478 = vmatmul.mubr.msk.f32.vlgmr.msra.gmra.mrb[0].mxu1 %vm1849_vm8, %v4546_v46  ;;  %v2377_v46 = vsel %vm1569_vm6, %v4624_v14, %v2376_v49  ;;  %v2746_v14 = vsel %vm1569_vm6, %v1560_v47, %v2745_v35 }
  0xb3   : > { %3534 = vmatmul.mubr.msk.f32.vlgmr.msra.gmra.mrb[0].mxu0 %vm1849_vm8, %v5080_v44  ;;  %3560 = vmatpush3.msk.msra.mxu1 %vm1866_vm0, %v3683_v39  ;;  %v2747_v18 = vsel %vm1571_vm7, %v1697_v24, %v2746_v14 }
  0xb4   : > { %3546 = vmatpush3.msk.msra.mxu0 %vm1866_vm0, %v4733_v63  ;;  %3536 = vmatprep.mubr.msk.f32.mxu0 %vm1849_vm8, %v5081_v6  ;;  %v5083_v63 = vld [vmem:[#allocation39_spill] sm:$0xff] }
  0xb5   : > { %3480 = vmatprep.mubr.msk.f32.mxu1 %vm1849_vm8, %v4587_v32  ;;  %v2378_v32 = vsel %vm1571_vm7, %v4640_v37, %v2377_v46 }
  0xb6   : > { %3481 = vmatmul.mubr.msk.f32.gmra.mrb[2].mxu1 %vm1849_vm8, %v4603_v17  ;;  %v1753_v17 = vsel %vm1698_vm1, %v1544_v36, %v1540_v28 }
  0xb7   : > { %3537 = vmatmul.mubr.msk.f32.gmra.mrb[2].mxu0 %vm1849_vm8, %v5082_v5  ;;  %3483 = vmatprep.mubr.msk.f32.mxu1 %vm1849_vm8, %v4672_v8  ;;  %v1754_v8 = vsel %vm1561_vm2, %v1548_v51, %v1753_v17 }
  0xb8   : > { %3539 = vmatprep.mubr.msk.f32.mxu0 %vm1849_vm8, %v5083_v63  ;;  %v1755_v37 = vsel %vm1563_vm3, %v1552_v13, %v1754_v8 }
  0xba   : > { %3484 = vmatmul.mubr.msk.f32.gmra.mrb[4].mxu1 %vm1849_vm8, %v4693_v43  ;;  %v1756_v43 = vsel %vm1565_vm4, %v1556_v62, %v1755_v37 }
  0xbb   : > { %3540 = vmatmul.mubr.msk.f32.gmra.mrb[4].mxu0 %vm1849_vm8, %v4458_v61  ;;  %3486 = vmatprep.mubr.msk.f32.mxu1 %vm1849_vm8, %v4707_v58  ;;  %v1757_v58 = vsel %vm1567_vm5, %v1560_v47, %v1756_v43 }
  0xbc   : > { %3542 = vmatprep.mubr.msk.f32.mxu0 %vm1849_vm8, %v2378_v32 }
  0xbe   : > { %3487 = vmatmul.mubr.msk.f32.gmra.mrb[6].mxu1 %vm1849_vm8, %v1646_v16 }
  0xbf   : > { %3543 = vmatmul.mubr.msk.f32.gmra.mrb[6].mxu0 %vm1849_vm8, %v2747_v18  ;;  %3497 = vmatprep.mubr.msk.f32.mxu1 %vm1849_vm8, %v5082_v5 }
  0xc0   : > { %3547 = vmatprep.mubr.msk.f32.mxu0 %vm1849_vm8, %v5077_v34  ;;  %v1758_v34 = vsel %vm1569_vm6, %v1697_v24, %v1757_v58 }
  0xc2   : > { %3498 = vmatmul.mubr.msk.f32.vlgmr.msra.gmra.mrb[4].mxu1 %vm1849_vm8, %v5083_v63 }
  0xc3   : > { %3548 = vmatmul.mubr.msk.f32.vlgmr.msra.gmra.mrb[0].mxu0 %vm1849_vm8, %v5078_v55  ;;  %3500 = vmatprep.mubr.msk.f32.mxu1 %vm1849_vm8, %v4458_v61 }
  0xc4   : > { %3550 = vmatprep.mubr.msk.f32.mxu0 %vm1849_vm8, %v4439_v19  ;;  %v1789_v19 = vsel %vm1779_vm9, %v1758_v34, %v1697_v24 }
  0xc6   : > { %3501 = vmatmul.mubr.msk.f32.gmra.mrb[6].mxu1 %vm1849_vm8, %v2378_v32 }
  0xc7   : > { %3551 = vmatmul.mubr.msk.f32.gmra.mrb[2].mxu0 %vm1849_vm8, %v4481_v40 }
  0xc8   : > { %3553 = vmatprep.mubr.msk.f32.mxu0 %vm1849_vm8, %v4542_v22  ;;  %v3340_v22 = vld [vmem:[%s4969_s4] ss:$0 sm:$0xff] }
  0xcb   : > { %3554 = vmatmul.mubr.msk.f32.gmra.mrb[4].mxu0 %vm1849_vm8, %v4562_v54 }
  0xcc   : > { %3556 = vmatprep.mubr.msk.f32.mxu0 %vm1849_vm8, %v4701_v29 }
  0xcf   : > { %3557 = vmatmul.mubr.msk.f32.gmra.mrb[6].mxu0 %vm1849_vm8, %v1789_v19 }
 0x185   : > { %v3479_v61 = vpop.f32.mrb[0].mxu1 }
 0x186   : > { %v2323_v10 = vpop.f32.mrb[1].mxu1 }
 0x189   : > { %v3482_v52 = vpop.f32.mrb[2].mxu1 }
 0x18a   : > { %v2333_v40 = vpop.f32.mrb[3].mxu1 }
 0x195   : > { %v3499_v50 = vpop.f32.mrb[4].mxu1 }
 0x196   : > { %v3549_v41 = vpop.f32.mrb[0].mxu0  ;;  %v2470_v15 = vpop.f32.mrb[5].mxu1 }
 0x197   : > { %v3561_v54 = vadd.f32 %v3549_v41, %v3479_v61  ;;  %v2940_v29 = vpop.f32.mrb[1].mxu0 }
 0x198   : > { %v3562_v33 = vadd.f32 %v2940_v29, %v2323_v10 }
 0x199   : > { %v2995_v39 = vadd.f32 %v3561_v54, %v3340_v22  ;;  %v3502_v2 = vpop.f32.mrb[6].mxu1 }
 0x19a   : > { %v2994_v30 = vadd.f32 %v3562_v33, %v3340_v22  ;;  %v3552_v20 = vpop.f32.mrb[2].mxu0  ;;  %v2480_v48 = vpop.f32.mrb[7].mxu1 }
 0x19b   : > { %v3003_v59 = vmax.f32 %v2995_v39, 0.0  ;;  %v3563_v55 = vadd.f32 %v3552_v20, %v3482_v52  ;;  %v2950_v1 = vpop.f32.mrb[3].mxu0 }
 0x19c   : > { %v3002_v9 = vmax.f32 %v2994_v30, 0.0  ;;  %v3564_v28 = vadd.f32 %v2950_v1, %v2333_v40 }
 0x19d   : > { %3012 = vst.msk [vmem:[%s4890_s13 + $0x8] sm:$0xff] %vm3010_vm11, %v3003_v59  ;;  %v2997_v16 = vadd.f32 %v3563_v55, %v3340_v22 }
 0x19e   : > { %3011 = vst.msk [vmem:[%s4890_s13] sm:$0xff] %vm3010_vm11, %v3002_v9  ;;  %v2996_v42 = vadd.f32 %v3564_v28, %v3340_v22  ;;  %v3555_v36 = vpop.f32.mrb[4].mxu0 }
 0x19f   : > { %v3005_v13 = vmax.f32 %v2997_v16, 0.0  ;;  %v3565_v51 = vadd.f32 %v3555_v36, %v3499_v50  ;;  %v2960_v62 = vpop.f32.mrb[5].mxu0 }
 0x1a0   : > { %v3004_v45 = vmax.f32 %v2996_v42, 0.0  ;;  %v3566_v47 = vadd.f32 %v2960_v62, %v2470_v15 }
 0x1a1   : > { %3014 = vst.msk [vmem:[%s4890_s13 + $0x18] sm:$0xff] %vm3010_vm11, %v3005_v13  ;;  %v2999_v56 = vadd.f32 %v3565_v51, %v3340_v22 }
 0x1a2   : > { %3013 = vst.msk [vmem:[%s4890_s13 + $0x10] sm:$0xff] %vm3010_vm11, %v3004_v45  ;;  %v2998_v7 = vadd.f32 %v3566_v47, %v3340_v22  ;;  %v3558_v23 = vpop.f32.mrb[6].mxu0 }
 0x1a3   : > { %v3007_v38 = vmax.f32 %v2999_v56, 0.0  ;;  %v3567_v53 = vadd.f32 %v3558_v23, %v3502_v2  ;;  %v2970_v57 = vpop.f32.mrb[7].mxu0 }
 0x1a4   : > { %v3006_v31 = vmax.f32 %v2998_v7, 0.0  ;;  %v3568_v4 = vadd.f32 %v2970_v57, %v2480_v48 }
 0x1a5   : > { %3016 = vst.msk [vmem:[%s4890_s13 + $0x28] sm:$0xff] %vm3010_vm11, %v3007_v38  ;;  %v3001_v26 = vadd.f32 %v3567_v53, %v3340_v22 }
 0x1a6   : > { %3015 = vst.msk [vmem:[%s4890_s13 + $0x20] sm:$0xff] %vm3010_vm11, %v3006_v31  ;;  %v3000_v3 = vadd.f32 %v3568_v4, %v3340_v22 }
 0x1a7   : > { %v3009_v25 = vmax.f32 %v3001_v26, 0.0 }
 0x1a8   : > { %v3008_v60 = vmax.f32 %v3000_v3, 0.0 }
 0x1a9   : > { %3018 = vst.msk [vmem:[%s4890_s13 + $0x38] sm:$0xff] %vm3010_vm11, %v3009_v25 }
 0x1aa   : > { %3017 = vst.msk [vmem:[%s4890_s13 + $0x30] sm:$0xff] %vm3010_vm11, %v3008_v60 }
 0x1ab   : > { %3697 = shalt.err (!%p3694_p5)
}
 0x1ac   : > { %s3698_s8 = scalar_lea.hbm %s4909_s24, 1024  ;;  %s3702_s11 = scalar_lea.hbm %s4970_s5, 2048 }
 0x1ad   : > { %p3699_p6 = scmp.ne.s32.totalorder %s4909_s24, %s3698_s8  ;;  %p3703_p10 = scmp.lt.u32.totalorder %s4909_s24, %s4970_s5 }
 0x1ae   : > { %p3704_p11 = scmp.lt.u32.totalorder %s3702_s11, %s3698_s8  ;;  %p3706_p13 = scmp.lt.u32.totalorder %s3698_s8, %s4909_s24 }
 0x1af   : > { %p3700_p7 = pnand %p3699_p6, %p3838_p4 }
 0x1b0   : > { %p3705_p12 = por %p3704_p11, %p3703_p10 }
 0x1b1   : > { %p3701_p9 = pneg %p3700_p7 }
 0x1b2   : > { %p3707_p0 = por %p3706_p13, %p3705_p12 }
 0x1b4   : > { %p3708_p1 = pnand %p3707_p0, %p3701_p9 }
 0x1b6   : > { %3711 = shalt.err (!%p3708_p1)
}
 0x1b7   : > { %s3766_s14 = smov 128   ;;  %s3767_s17 = smov 8  }
 0x1b8   : > { %3625 = dma.vmem_to_hbm [thread:$0]  (%p3838_p4), %s4911_s15, 1024, %s4909_s24, %s4919_s21, %s3766_s14, %s3766_s14, %s3767_s17  }
 0x1b9 PF: > { %p3631_p2 = scmp.ge.s32.totalorder %s3762_s23, 2  ;;  %s3050_s16 = sand.u32 1, %s3742_s18  }
 0x1ba   : > { %s3051_s25 = scalar_lea.sflag [#allocation3], %s3050_s16 }
 0x1bb   : > { %p3628_p3 = pnand %p3631_p2, %p3845_p8 }
 0x1bd   : > { %3737 = dma.done.wait (!%p3628_p3), %s3051_s25, 1024  }
 0x1be   : > { %3739 = vsyncadd (!%p3628_p3), %s3051_s25, 4294966272  ;;  %s18_s23 = sadd.s32 1, %s3762_s23   ;;  %s5084_s18 = smov %s3746_s19 }
 0x1bf   : > { %p15_p5 = scmp.ge.s32.totalorder %s18_s23, 4   ;;  %s5085_s19 = smov %s3750_s20 }
 0x1c0   : > { %s5086_s20 = smov %s3851_s6  ;;  %s5087_s21 = smov %s3758_s22 }
 0x1c1   : > { %s5088_s22 = smov %s5090_s26  ;;  %17 = sbr.rel (!%p15_p5) target bundleno = 4 (0x4), region = 89 }
 0x1c8   :  { %3056 = vsyncpa [#allocation3], 1 }
 0x1c9   :  { %3058 = vsyncpa [#allocation3 + $0x1], 1 }

</bundles_post_ra>
